<compile_context>
chip_gen: v5e
topology: v5e:2x2
jax: 0.10.0
libtpu: 0.0.40
codegen_flags: <defaults>
</compile_context>

<pallas_src>
import functools

import jax
import jax.numpy as jnp
from jax.experimental import pallas as pl
from jax.experimental.pallas import tpu as pltpu

_OUT_PAD = 128   # classifier logits padded to one lane-dense group


def _round_up(n, m):
    return (n + m - 1) // m * m


def _tfp_kernel(x_ref, w1_ref, wgcn_ref, wc_ref, bias_ref, out_ref,
                *, num_labels, struct_dim):
    L, D = num_labels, struct_dim
    LD = L * D

    biases = bias_ref[...]                       # (3, 5*LD) f32
    b1 = biases[0:1, :LD]                        # linear_transformation bias
    b_gcn = biases[1:2, :]                       # [eb_in | eb_out | lane-expanded gate biases]
    bc = biases[2:3, :_OUT_PAD]                  # classifier bias (padded)

    # ---- linear_transformation (bf16 MXU, f32 accumulate) + bias ----
    x = x_ref[...].astype(w1_ref.dtype)          # VPU cast; x stays f32/unpadded in HBM
    node = jnp.dot(x, w1_ref[...],
                   preferred_element_type=jnp.float32) + b1          # (TB, LD) f32

    # ---- LayerNorm (elementwise_affine=False, eps=1e-5): one-pass E[x], E[x^2] ----
    mu = jnp.mean(node, axis=-1, keepdims=True)
    m2 = jnp.mean(node * node, axis=-1, keepdims=True)
    var = jnp.maximum(m2 - mu * mu, 0.0)         # guard mild cancellation
    node = (node - mu) * jax.lax.rsqrt(var + 1e-5)

    # ---- dropout: identity (eval mode) ----
    # TODO(synk): training-mode dropout (feature_aggregation.dropout / GCN dropout) not modeled.

    # ---- One combined GCN matmul: [in-msgs | out-msgs | lane-expanded gate logits] ----
    z = jnp.dot(node.astype(wgcn_ref.dtype), wgcn_ref[...],
                preferred_element_type=jnp.float32) + b_gcn          # (TB, 5*LD)

    h_in = z[:, :LD]
    h_out = z[:, LD:2 * LD]
    g = jax.nn.sigmoid(z[:, 2 * LD:])            # (TB, 3*LD) gates, already per-feature lanes

    msg = (h_in * g[:, :LD]
           + h_out * g[:, LD:2 * LD]
           + node * g[:, 2 * LD:])
    feat = jax.nn.relu(msg)                                          # (TB, LD)

    # ---- Batched classifier (stacked per-label heads), lane-dense padded output ----
    logits = jnp.dot(feat.astype(wc_ref.dtype), wc_ref[...],
                     preferred_element_type=jnp.float32) + bc        # (TB, 128)
    out_ref[...] = logits.astype(out_ref.dtype)


def pack_params(p, *, num_labels, struct_dim, matmul_dtype=jnp.bfloat16):
    """Fold / pad / consolidate the module's parameters into 4 kernel operands."""
    L, D = num_labels, struct_dim
    LD = L * D
    assert L <= _OUT_PAD, "label count too large for the padded classifier output"
    # NOTE(v5e scaling): kron-folding makes w_gcn O((L*D)^2) (5*LD*LD bf16 bytes) and
    # inflates adjacency FLOPs by a factor of D; at this config (LD=256) it is the right
    # trade, but re-evaluate against an explicit (L, D) formulation if LD grows past ~1-2K.
    f32 = jnp.float32
    eye_d = jnp.eye(D, dtype=f32)
    eye_l = jnp.eye(L, dtype=f32)
    ones_d = jnp.ones((1, D), f32)

    # kron-folded adjacency so GCN aggregation runs on the flat (B, L*D) layout
    w_in = jnp.kron(p["a_in"].T.astype(f32), eye_d)                   # (LD, LD)
    w_out = jnp.kron(p["a_out"].T.astype(f32), eye_d)                 # (LD, LD)

    # Gate projections with the D-fold lane replication folded in at pack time:
    # each label's scalar gate logit is replicated across its D feature lanes, so
    # sigmoid(z) in the kernel is already the lane-expanded gate (no expansion matmul).
    gate_proj = jnp.concatenate(
        [jnp.kron(eye_l, p["gw_in"].astype(f32) @ ones_d),
         jnp.kron(eye_l, p["gw_out"].astype(f32) @ ones_d),
         jnp.kron(eye_l, p["gw_loop"].astype(f32) @ ones_d)], axis=1)  # (LD, 3*LD)

    w_gcn = jnp.concatenate([w_in, w_out, gate_proj], axis=1)         # (LD, 5*LD)

    # classifier weight padded to a lane-dense 128-wide output
    wc_pad = jnp.pad(p["wc"].astype(f32), ((0, 0), (0, _OUT_PAD - L)))  # (LD, 128)

    # all biases consolidated into one (3, 5*LD) f32 array
    W = 5 * LD
    gate_bias = jnp.concatenate(
        [jnp.repeat(p["gb_in"].reshape(L).astype(f32), D),
         jnp.repeat(p["gb_out"].reshape(L).astype(f32), D),
         jnp.zeros((LD,), f32)])                                       # (3*LD,)
    b_gcn = jnp.concatenate(
        [p["eb_in"].reshape(LD).astype(f32),
         p["eb_out"].reshape(LD).astype(f32),
         gate_bias])                                                   # (5*LD,)
    b1 = jnp.pad(p["b1"].reshape(LD).astype(f32), (0, W - LD))
    bc = jnp.pad(p["bc"].reshape(L).astype(f32), (0, W - L))
    biases = jnp.stack([b1, b_gcn, bc], axis=0)                        # (3, 5*LD)

    return dict(
        w1=p["w1"].astype(matmul_dtype),        # (F, LD)     bf16 matmul operand
        w_gcn=w_gcn.astype(matmul_dtype),       # (LD, 5*LD)  bf16
        wc=wc_pad.astype(matmul_dtype),         # (LD, 128)   bf16
        biases=biases,                          # (3, 5*LD)   f32
    )


def text_feature_propagation(x, packed, *, num_labels, struct_dim,
                             out_dtype=jnp.bfloat16):
    """x: (B, F) flattened CNN features. Returns logits (B, num_labels)."""
    L, D = num_labels, struct_dim
    B, F = x.shape

    # Batch tiling: >= 2 grid blocks whenever splittable (keeps both v7x TensorCores
    # busy via the "parallel" axis); block capped at 512 rows (grid-step overhead
    # negligible, per-block VMEM footprint tiny on all generations).
    if B < 16:
        TB = B
    else:
        TB = min(512, _round_up(pl.cdiv(B, 2), 8))
    grid = pl.cdiv(B, TB)
    # No wrapper-side padding of x: Pallas masks the ragged last batch block; every op
    # in the kernel is row-wise, so garbage rows never mix into valid rows and are
    # discarded by the final [:B] slice.

    kernel = functools.partial(_tfp_kernel, num_labels=L, struct_dim=D)
    out = pl.pallas_call(
        kernel,
        out_shape=jax.ShapeDtypeStruct((B, _OUT_PAD), out_dtype),
        grid_spec=pltpu.PrefetchScalarGridSpec(
            num_scalar_prefetch=0,
            grid=(grid,),
            in_specs=[
                pl.BlockSpec((TB, F), lambda i: (i, 0)),
                pl.BlockSpec(packed["w1"].shape, lambda i: (0, 0)),
                pl.BlockSpec(packed["w_gcn"].shape, lambda i: (0, 0)),
                pl.BlockSpec(packed["wc"].shape, lambda i: (0, 0)),
                pl.BlockSpec(packed["biases"].shape, lambda i: (0, 0)),
            ],
            out_specs=pl.BlockSpec((TB, _OUT_PAD), lambda i: (i, 0)),
        ),
        compiler_params=pltpu.CompilerParams(
            dimension_semantics=("parallel",)),
    )(x, packed["w1"], packed["w_gcn"], packed["wc"], packed["biases"])
    # Consumers that can take the lane-padded (B, 128) bf16 block should use `out`
    # directly; this narrow slice is kept only to match the module's (B, L) signature.
    return out[:B, :L]


def _make_params(key, feat_dim, num_labels, struct_dim):
    L, D, F = num_labels, struct_dim, feat_dim
    LD = L * D
    keys = jax.random.split(key, 12)
    scale = 0.1
    w1 = scale * jax.random.normal(keys[0], (F, LD), jnp.float32)
    b1 = scale * jax.random.normal(keys[1], (1, LD), jnp.float32)
    a_in = jax.nn.softmax(jax.random.normal(keys[2], (L, L), jnp.float32), axis=-1)
    a_out = jax.nn.softmax(jax.random.normal(keys[3], (L, L), jnp.float32), axis=-1)
    eb_in = scale * jax.random.normal(keys[4], (L, D), jnp.float32)
    eb_out = scale * jax.random.normal(keys[5], (L, D), jnp.float32)
    gw_in = scale * jax.random.normal(keys[6], (D, 1), jnp.float32)
    gb_in = scale * jax.random.normal(keys[7], (L, 1), jnp.float32)
    gw_out = scale * jax.random.normal(keys[8], (D, 1), jnp.float32)
    gb_out = scale * jax.random.normal(keys[9], (L, 1), jnp.float32)
    gw_loop = scale * jax.random.normal(keys[10], (D, 1), jnp.float32)
    kc1, kc2 = jax.random.split(keys[11])
    wc = scale * jax.random.normal(kc1, (LD, L), jnp.float32)
    bc = scale * jax.random.normal(kc2, (1, L), jnp.float32)
    return dict(w1=w1, b1=b1, a_in=a_in, a_out=a_out, eb_in=eb_in, eb_out=eb_out,
                gw_in=gw_in, gb_in=gb_in, gw_out=gw_out, gb_out=gb_out,
                gw_loop=gw_loop, wc=wc, bc=bc)


def _reference(x, p, num_labels, struct_dim):
    # pure-JAX f32 reference of the same forward pass (validates the kron/packing math too)
    L, D = num_labels, struct_dim
    node = x @ p["w1"] + p["b1"]
    mu = node.mean(-1, keepdims=True)
    var = ((node - mu) ** 2).mean(-1, keepdims=True)
    node = (node - mu) / jnp.sqrt(var + 1e-5)
    h = node.reshape(x.shape[0], L, D)
    h_in = jnp.einsum("ij,bjd->bid", p["a_in"], h) + p["eb_in"]
    g_in = jax.nn.sigmoid(h @ p["gw_in"] + p["gb_in"])
    h_out = jnp.einsum("ij,bjd->bid", p["a_out"], h) + p["eb_out"]
    g_out = jax.nn.sigmoid(h @ p["gw_out"] + p["gb_out"])
    g_loop = jax.nn.sigmoid(h @ p["gw_loop"])
    msg = h_in * g_in + h_out * g_out + h * g_loop
    feat = jax.nn.relu(msg).reshape(x.shape[0], L * D)
    return feat @ p["wc"] + p["bc"]


if __name__ == "__main__":
    # Small config consistent with the module:
    #   pooling_k=2, cnn.dimension=16, 3 CNN kernel sizes -> F = 2*16*3 = 96
    #   num labels L = 8, structure_encoder.dimension D = 32 -> L*D = 256
    B, POOL_K, CNN_DIM, N_KERNELS = 2, 2, 16, 3
    L, D = 8, 32
    F = POOL_K * CNN_DIM * N_KERNELS

    key = jax.random.PRNGKey(0)
    k_x, k_p, k_x2 = jax.random.split(key, 3)
    params = _make_params(k_p, F, L, D)
    packed = pack_params(params, num_labels=L, struct_dim=D)

    # --- small batch (single block path) ---
    x = jax.random.normal(k_x, (B, F), jnp.float32)
    logits = text_feature_propagation(x, packed, num_labels=L, struct_dim=D)
    logits = jax.block_until_ready(logits).astype(jnp.float32)
    ref = _reference(x, params, L, D)
    assert logits.shape == (B, L)
    # bf16 matmul operands + bf16 output (f32 accumulation) -> loose tol vs f32 reference
    assert jnp.allclose(logits, ref, atol=5e-2, rtol=5e-2), float(jnp.max(jnp.abs(logits - ref)))

    # --- larger, non-divisible batch (multi-block "parallel" grid + ragged last block) ---
    B2 = 37
    x2 = jax.random.normal(k_x2, (B2, F), jnp.float32)
    logits2 = text_feature_propagation(x2, packed, num_labels=L, struct_dim=D)
    logits2 = jax.block_until_ready(logits2).astype(jnp.float32)
    ref2 = _reference(x2, params, L, D)
    assert logits2.shape == (B2, L)
    assert jnp.allclose(logits2, ref2, atol=5e-2, rtol=5e-2), float(jnp.max(jnp.abs(logits2 - ref2)))

    print("KERNEL_OK")
</pallas_src>

<mosaic_0001>
module attributes {stable_mosaic.version = 11 : i64} {
  func.func @_tfp_kernel(%arg0: i32, %arg1: memref<2x96xf32, #tpu.memory_space<vmem>>, %arg2: memref<96x256xbf16, #tpu.memory_space<vmem>>, %arg3: memref<256x1280xbf16, #tpu.memory_space<vmem>>, %arg4: memref<256x128xbf16, #tpu.memory_space<vmem>>, %arg5: memref<3x1280xf32, #tpu.memory_space<vmem>>, %arg6: memref<2x128xbf16, #tpu.memory_space<vmem>>) attributes {dimension_semantics = [#tpu.dimension_semantics<parallel>], iteration_bounds = array<i64: 1>, scalar_prefetch = 0 : i64, scratch_operands = 0 : i64, tpu.core_type = #tpu.core_type<tc>, window_params = [{transform_indices = @transform_0, window_bounds = array<i64: 2, 96>}, {pipeline_mode = #tpu.pipeline_mode<synchronous>, transform_indices = @transform_1, window_bounds = array<i64: 96, 256>}, {pipeline_mode = #tpu.pipeline_mode<synchronous>, transform_indices = @transform_2, window_bounds = array<i64: 256, 1280>}, {pipeline_mode = #tpu.pipeline_mode<synchronous>, transform_indices = @transform_3, window_bounds = array<i64: 256, 128>}, {pipeline_mode = #tpu.pipeline_mode<synchronous>, transform_indices = @transform_4, window_bounds = array<i64: 3, 1280>}, {transform_indices = @transform_5, window_bounds = array<i64: 2, 128>}]} {
    %c0 = arith.constant 0 : index
    %c0_0 = arith.constant 0 : index
    %0 = vector.load %arg5[%c0, %c0_0] : memref<3x1280xf32, #tpu.memory_space<vmem>>, vector<3x1280xf32>
    %1 = vector.extract_strided_slice %0 {offsets = [0, 0], sizes = [1, 256], strides = [1, 1]} : vector<3x1280xf32> to vector<1x256xf32>
    %2 = vector.extract_strided_slice %0 {offsets = [1, 0], sizes = [1, 1280], strides = [1, 1]} : vector<3x1280xf32> to vector<1x1280xf32>
    %3 = vector.extract_strided_slice %0 {offsets = [2, 0], sizes = [1, 128], strides = [1, 1]} : vector<3x1280xf32> to vector<1x128xf32>
    %c0_1 = arith.constant 0 : index
    %c0_2 = arith.constant 0 : index
    %4 = vector.load %arg1[%c0_1, %c0_2] : memref<2x96xf32, #tpu.memory_space<vmem>>, vector<2x96xf32>
    %5 = arith.truncf %4 : vector<2x96xf32> to vector<2x96xbf16>
    %c0_3 = arith.constant 0 : index
    %c0_4 = arith.constant 0 : index
    %6 = vector.load %arg2[%c0_3, %c0_4] : memref<96x256xbf16, #tpu.memory_space<vmem>>, vector<96x256xbf16>
    %cst = arith.constant dense<0.000000e+00> : vector<2x256xf32>
    %7 = tpu.matmul %5, %6, %cst {dimension_numbers = #tpu.dot_dimension_numbers<[1], [0], [0], [1], [0, 0, 1, 1], [], []>} : vector<2x96xbf16>, vector<96x256xbf16>, vector<2x256xf32> -> vector<2x256xf32>
    %8 = vector.broadcast %1 : vector<1x256xf32> to vector<2x256xf32>
    %9 = arith.addf %7, %8 : vector<2x256xf32>
    %cst_5 = arith.constant dense<0.000000e+00> : vector<2xf32>
    %10 = vector.multi_reduction <add>, %9, %cst_5 [1] : vector<2x256xf32> to vector<2xf32>
    %11 = vector.shape_cast %10 : vector<2xf32> to vector<2x1xf32>
    %cst_6 = arith.constant 2.560000e+02 : f32
    %12 = vector.broadcast %cst_6 : f32 to vector<2x1xf32>
    %13 = arith.divf %11, %12 : vector<2x1xf32>
    %14 = arith.mulf %9, %9 : vector<2x256xf32>
    %cst_7 = arith.constant dense<0.000000e+00> : vector<2xf32>
    %15 = vector.multi_reduction <add>, %14, %cst_7 [1] : vector<2x256xf32> to vector<2xf32>
    %16 = vector.shape_cast %15 : vector<2xf32> to vector<2x1xf32>
    %cst_8 = arith.constant 2.560000e+02 : f32
    %17 = vector.broadcast %cst_8 : f32 to vector<2x1xf32>
    %18 = arith.divf %16, %17 : vector<2x1xf32>
    %19 = arith.mulf %13, %13 : vector<2x1xf32>
    %20 = arith.subf %18, %19 : vector<2x1xf32>
    %cst_9 = arith.constant 0.000000e+00 : f32
    %21 = vector.broadcast %cst_9 : f32 to vector<2x1xf32>
    %22 = arith.maximumf %20, %21 : vector<2x1xf32>
    %23 = vector.broadcast %13 : vector<2x1xf32> to vector<2x256xf32>
    %24 = arith.subf %9, %23 : vector<2x256xf32>
    %cst_10 = arith.constant 9.99999974E-6 : f32
    %25 = vector.broadcast %cst_10 : f32 to vector<2x1xf32>
    %26 = arith.addf %22, %25 : vector<2x1xf32>
    %27 = math.rsqrt %26 : vector<2x1xf32>
    %28 = vector.broadcast %27 : vector<2x1xf32> to vector<2x256xf32>
    %29 = arith.mulf %24, %28 : vector<2x256xf32>
    %30 = arith.truncf %29 : vector<2x256xf32> to vector<2x256xbf16>
    %c0_11 = arith.constant 0 : index
    %c0_12 = arith.constant 0 : index
    %31 = vector.load %arg3[%c0_11, %c0_12] : memref<256x1280xbf16, #tpu.memory_space<vmem>>, vector<256x1280xbf16>
    %cst_13 = arith.constant dense<0.000000e+00> : vector<2x1280xf32>
    %32 = tpu.matmul %30, %31, %cst_13 {dimension_numbers = #tpu.dot_dimension_numbers<[1], [0], [0], [1], [0, 0, 1, 1], [], []>} : vector<2x256xbf16>, vector<256x1280xbf16>, vector<2x1280xf32> -> vector<2x1280xf32>
    %33 = vector.broadcast %2 : vector<1x1280xf32> to vector<2x1280xf32>
    %34 = arith.addf %32, %33 : vector<2x1280xf32>
    %35 = vector.extract_strided_slice %34 {offsets = [0, 0], sizes = [2, 256], strides = [1, 1]} : vector<2x1280xf32> to vector<2x256xf32>
    %36 = vector.extract_strided_slice %34 {offsets = [0, 256], sizes = [2, 256], strides = [1, 1]} : vector<2x1280xf32> to vector<2x256xf32>
    %37 = vector.extract_strided_slice %34 {offsets = [0, 512], sizes = [2, 768], strides = [1, 1]} : vector<2x1280xf32> to vector<2x768xf32>
    %38 = arith.negf %37 : vector<2x768xf32>
    %39 = math.exp %38 : vector<2x768xf32>
    %cst_14 = arith.constant 1.000000e+00 : f32
    %40 = vector.broadcast %cst_14 : f32 to vector<2x768xf32>
    %41 = arith.addf %40, %39 : vector<2x768xf32>
    %42 = arith.divf %40, %41 : vector<2x768xf32>
    %43 = vector.extract_strided_slice %42 {offsets = [0, 0], sizes = [2, 256], strides = [1, 1]} : vector<2x768xf32> to vector<2x256xf32>
    %44 = arith.mulf %35, %43 : vector<2x256xf32>
    %45 = vector.extract_strided_slice %42 {offsets = [0, 256], sizes = [2, 256], strides = [1, 1]} : vector<2x768xf32> to vector<2x256xf32>
    %46 = arith.mulf %36, %45 : vector<2x256xf32>
    %47 = arith.addf %44, %46 : vector<2x256xf32>
    %48 = vector.extract_strided_slice %42 {offsets = [0, 512], sizes = [2, 256], strides = [1, 1]} : vector<2x768xf32> to vector<2x256xf32>
    %49 = arith.mulf %29, %48 : vector<2x256xf32>
    %50 = arith.addf %47, %49 : vector<2x256xf32>
    %cst_15 = arith.constant 0.000000e+00 : f32
    %51 = vector.broadcast %cst_15 : f32 to vector<2x256xf32>
    %52 = arith.maximumf %50, %51 : vector<2x256xf32>
    %53 = arith.truncf %52 : vector<2x256xf32> to vector<2x256xbf16>
    %c0_16 = arith.constant 0 : index
    %c0_17 = arith.constant 0 : index
    %54 = vector.load %arg4[%c0_16, %c0_17] : memref<256x128xbf16, #tpu.memory_space<vmem>>, vector<256x128xbf16>
    %cst_18 = arith.constant dense<0.000000e+00> : vector<2x128xf32>
    %55 = tpu.matmul %53, %54, %cst_18 {dimension_numbers = #tpu.dot_dimension_numbers<[1], [0], [0], [1], [0, 0, 1, 1], [], []>} : vector<2x256xbf16>, vector<256x128xbf16>, vector<2x128xf32> -> vector<2x128xf32>
    %56 = vector.broadcast %3 : vector<1x128xf32> to vector<2x128xf32>
    %57 = arith.addf %55, %56 : vector<2x128xf32>
    %58 = arith.truncf %57 : vector<2x128xf32> to vector<2x128xbf16>
    %c0_19 = arith.constant 0 : index
    %c0_20 = arith.constant 0 : index
    %59 = vector.load %arg6[%c0_19, %c0_20] : memref<2x128xbf16, #tpu.memory_space<vmem>>, vector<2x128xbf16>
    tpu.vector_store %arg6[%c0_19, %c0_20], %58 {strides = array<i32>} : memref<2x128xbf16, #tpu.memory_space<vmem>>, vector<2x128xbf16>,
    return
  }
  func.func @transform_0(%arg0: i32) -> (i32, i32) {
    %c0_i32 = arith.constant 0 : i32
    %c0_i32_0 = arith.constant 0 : i32
    return %arg0, %c0_i32 : i32, i32
  }
  func.func @transform_1(%arg0: i32) -> (i32, i32) {
    %c0_i32 = arith.constant 0 : i32
    %c0_i32_0 = arith.constant 0 : i32
    %c0_i32_1 = arith.constant 0 : i32
    return %c0_i32, %c0_i32_0 : i32, i32
  }
  func.func @transform_2(%arg0: i32) -> (i32, i32) {
    %c0_i32 = arith.constant 0 : i32
    %c0_i32_0 = arith.constant 0 : i32
    %c0_i32_1 = arith.constant 0 : i32
    return %c0_i32, %c0_i32_0 : i32, i32
  }
  func.func @transform_3(%arg0: i32) -> (i32, i32) {
    %c0_i32 = arith.constant 0 : i32
    %c0_i32_0 = arith.constant 0 : i32
    %c0_i32_1 = arith.constant 0 : i32
    return %c0_i32, %c0_i32_0 : i32, i32
  }
  func.func @transform_4(%arg0: i32) -> (i32, i32) {
    %c0_i32 = arith.constant 0 : i32
    %c0_i32_0 = arith.constant 0 : i32
    %c0_i32_1 = arith.constant 0 : i32
    return %c0_i32, %c0_i32_0 : i32, i32
  }
  func.func @transform_5(%arg0: i32) -> (i32, i32) {
    %c0_i32 = arith.constant 0 : i32
    %c0_i32_0 = arith.constant 0 : i32
    return %arg0, %c0_i32 : i32, i32
  }
}

</mosaic_0001>

<bundles_post_ra>
// kernel: tpu_custom_call.1
= control target key start
LH: loop header
LB: loop body
LE: loop exit
PB: predicated region body
PF: predicated region fallthrough
CT: control target
= control target key end

     0   :  { %10 = vsyncpa [#allocation3], 0  ;;  %s3148_s0 = inlined_call_operand.hbm [shape: f32[2,96], index: 0, kind: input, shape index: {}]   ;;  %s3149_s1 = inlined_call_operand.hbm [shape: bf16[96,256], index: 1, kind: input, shape index: {}]   ;;  %s3150_s2 = inlined_call_operand.hbm [shape: bf16[256,1280], index: 2, kind: input, shape index: {}]   ;;  %s3151_s3 = inlined_call_operand.hbm [shape: bf16[256,128], index: 3, kind: input, shape index: {}]   ;;  %s3152_s4 = inlined_call_operand.hbm [shape: f32[3,1280], index: 4, kind: input, shape index: {}]   ;;  %s3153_s5 = inlined_call_operand.hbm [shape: bf16[2,128], index: 5, kind: output, shape index: {}]  }
   0x1   :  { %11 = vsyncpa [#allocation6], 0 }
   0x2   :  { %12 = vsyncpa [#allocation9], 0  ;;  %s29_s20 = sshll.u32 %s3149_s1, 4  ;;  %s30_s20 = int_to_ptr.hbm [resolvable:$true] %s29_s20 }
   0x3   :  { %13 = vsyncpa [#allocation4], 0  ;;  %s2954_s21 = smov [#allocation5]   ;;  %s55_s25 = sshll.u32 %s3151_s3, 4  ;;  %s56_s25 = int_to_ptr.hbm [resolvable:$true] %s55_s25 }
   0x4   :  { %s31_s22 = sshll.u32 %s2954_s21, 4  ;;  %s2955_s26 = smov 128   ;;  %s32_s22 = int_to_ptr.vmem [resolvable:$true] %s31_s22 }
   0x5   :  { %s2956_s27 = smov 8   ;;  %s2957_s28 = smov [#allocation8]  }
   0x6   :  { %37 = dma.hbm_to_vmem [thread:$0]  %s30_s20, 1536, %s32_s22, [#allocation6], %s2955_s26, %s2955_s26, %s2956_s27  }
   0x7   :  { %s57_s29 = sshll.u32 %s2957_s28, 4  ;;  %s2958_s30 = smov 64   ;;  %s58_s29 = int_to_ptr.vmem [resolvable:$true] %s57_s29 }
   0x8   :  { %s2959_s6 = smov 4   ;;  %s19_s8 = sshll.u32 %s3148_s0, 4  ;;  %s20_s8 = int_to_ptr.hbm [resolvable:$true] %s19_s8 }
   0x9   :  { %63 = dma.hbm_to_vmem [thread:$0]  %s56_s25, 2048, %s58_s29, [#allocation9], %s2958_s30, %s2958_s30, %s2959_s6  }
   0xa   :  { %s2960_s9 = smov [#allocation2]   ;;  %s42_s12 = sshll.u32 %s3150_s2, 4  ;;  %s43_s12 = int_to_ptr.hbm [resolvable:$true] %s42_s12 }
   0xb   :  { %s21_s10 = sshll.u32 %s2960_s9, 4  ;;  %s2961_s13 = smov [#allocation7]   ;;  %s22_s10 = int_to_ptr.vmem [resolvable:$true] %s21_s10 }
   0xc   :  { %24 = dma.hbm_to_vmem [thread:$0]  %s20_s8, 32, %s22_s10, [#allocation3]  }
   0xd   :  { %s44_s14 = sshll.u32 %s2961_s13, 4  ;;  %s2962_s15 = smov 640   ;;  %s45_s14 = int_to_ptr.vmem [resolvable:$true] %s44_s14 }
   0xe   :  { %s2963_s16 = smov 40   ;;  %s69_s0 = sshll.u32 %s3152_s4, 4  ;;  %s70_s0 = int_to_ptr.hbm [resolvable:$true] %s69_s0 }
   0xf   :  { %50 = dma.hbm_to_vmem [thread:$0]  %s43_s12, 20480, %s45_s14, [#allocation6], %s2962_s15, %s2962_s15, %s2963_s16  }
  0x10   :  { %s2964_s19 = smov [#allocation10]  }
  0x11   :  { %s71_s20 = sshll.u32 %s2964_s19, 4  ;;  %s72_s20 = int_to_ptr.vmem [resolvable:$true] %s71_s20 }
  0x12   :  { %74 = dma.hbm_to_vmem [thread:$0]  %s70_s0, 640, %s72_s20, [#allocation9]  }
  0x13   :  { %2946 = dma.done.wait [#allocation3], 32  }
  0x14   :  { %2947 = vsyncadd [#allocation3], 4294967264 }
  0x15   :  { %2948 = dma.done.wait [#allocation6], 22016  }
  0x16   :  { %2949 = vsyncadd [#allocation6], 4294945280 }
  0x17   :  { %2950 = dma.done.wait [#allocation9], 2688  }
  0x18   :  { %2951 = vsyncadd [#allocation9], 4294964608  ;;  %v1854_v0 = vld [vmem:[#allocation5 + $0x50] sm:$0xf]  ;;  %v2583_v1 = vld [vmem:[#allocation5 + $0x54] sm:$0xf0] }
  0x19   :  { %v2582_v2 = vld [vmem:[#allocation5 + $0x54] sm:$0xf]  ;;  %v1855_v3 = vor.u32 %v2583_v1, %v1854_v0  ;;  %v1856_v4 = vld [vmem:[#allocation5 + $0x58] sm:$0xf0]  ;;  %v1846_v5 = vld [vmem:[#allocation5 + $0x40] sm:$0xf] }
  0x1a   :  { %v2581_v6 = vld [vmem:[#allocation5 + $0x44] sm:$0xf0]  ;;  %v1859_v7 = vor.u32 %v2582_v2, %v1856_v4  ;;  %v2580_v8 = vld [vmem:[#allocation5 + $0x44] sm:$0xf]  ;;  %v1848_v9 = vld [vmem:[#allocation5 + $0x48] sm:$0xf0] }
  0x1b   :  { %188 = vmatpush.bf16.msra.mxu0 %v1855_v3  ;;  %v1847_v10 = vor.u32 %v2581_v6, %v1846_v5  ;;  %v1851_v11 = vor.u32 %v2580_v8, %v1848_v9  ;;  %v1838_v12 = vld [vmem:[#allocation5 + $0x30] sm:$0xf]  ;;  %v2579_v13 = vld [vmem:[#allocation5 + $0x34] sm:$0xf0]  ;;  %v2578_v14 = vld [vmem:[#allocation5 + $0x34] sm:$0xf] }
  0x1c   :  { %201 = vmatpush.bf16.msra.mxu1 %v1859_v7  ;;  %v1840_v15 = vld [vmem:[#allocation5 + $0x38] sm:$0xf0]  ;;  %v1839_v16 = vor.u32 %v2579_v13, %v1838_v12  ;;  %v1830_v18 = vld [vmem:[#allocation5 + $0x20] sm:$0xf]  ;;  %v2577_v19 = vld [vmem:[#allocation5 + $0x24] sm:$0xf0] }
  0x1d   :  { %v1843_v17 = vor.u32 %v2578_v14, %v1840_v15  ;;  %v2576_v20 = vld [vmem:[#allocation5 + $0x24] sm:$0xf]  ;;  %v1832_v21 = vld [vmem:[#allocation5 + $0x28] sm:$0xf0]  ;;  %v1831_v22 = vor.u32 %v2577_v19, %v1830_v18  ;;  %v1822_v24 = vld [vmem:[#allocation5 + $0x10] sm:$0xf] }
  0x1e   :  { %v1835_v23 = vor.u32 %v2576_v20, %v1832_v21  ;;  %v2575_v25 = vld [vmem:[#allocation5 + $0x14] sm:$0xf0]  ;;  %v2574_v26 = vld [vmem:[#allocation5 + $0x14] sm:$0xf]  ;;  %v1824_v27 = vld [vmem:[#allocation5 + $0x18] sm:$0xf0] }
  0x1f   :  { %189 = vmatpush.bf16.msra.mxu0 %v1847_v10  ;;  %v1823_v28 = vor.u32 %v2575_v25, %v1822_v24  ;;  %v1827_v29 = vor.u32 %v2574_v26, %v1824_v27  ;;  %v1814_v30 = vld [vmem:[#allocation5] sm:$0xf]  ;;  %v2573_v31 = vld [vmem:[#allocation5 + $0x4] sm:$0xf0]  ;;  %v2572_v32 = vld [vmem:[#allocation5 + $0x4] sm:$0xf] }
  0x20   :  { %202 = vmatpush.bf16.msra.mxu1 %v1851_v11  ;;  %v1816_v33 = vld [vmem:[#allocation5 + $0x8] sm:$0xf0]  ;;  %v1815_v34 = vor.u32 %v2573_v31, %v1814_v30  ;;  %v101_v35 = vld [vmem:[#allocation2] sm:$0x3]  ;;  %vm182_vm0 = vcmask 785408   ;;  %vm212_vm1 = vcmask 1041408  }
  0x21   :  { %v1819_v36 = vor.u32 %v2572_v32, %v1816_v33  ;;  %v102_v37 = vpack.c.bf16 %v101_v35, %v101_v35  ;;  %v2144_v38 = vld [vmem:[#allocation7 + $0x230] sm:$0xf]  ;;  %v2659_v39 = vld [vmem:[#allocation7 + $0x254] sm:$0xf0]  ;;  %v2654_v43 = vld [vmem:[#allocation7 + $0x234] sm:$0xf] }
  0x22   :  { %v2464_v40 = vld [vmem:[#allocation7 + $0x4b0] sm:$0xf]  ;;  %v2145_v41 = vor.u32 %v2659_v39, %v2144_v38  ;;  %v2739_v42 = vld [vmem:[#allocation7 + $0x4d4] sm:$0xf0]  ;;  %v2146_v44 = vld [vmem:[#allocation7 + $0x258] sm:$0xf0] }
  0x23   :  { %190 = vmatpush.bf16.msra.mxu0 %v1839_v16  ;;  %v2465_v45 = vor.u32 %v2739_v42, %v2464_v40  ;;  %v2149_v46 = vor.u32 %v2654_v43, %v2146_v44  ;;  %v2734_v47 = vld [vmem:[#allocation7 + $0x4b4] sm:$0xf]  ;;  %v2466_v48 = vld [vmem:[#allocation7 + $0x4d8] sm:$0xf0]  ;;  %v2104_v49 = vld [vmem:[#allocation7 + $0x1e0] sm:$0xf] }
  0x24   :  { %203 = vmatpush.bf16.msra.mxu1 %v1843_v17  ;;  %1248 = vmatpush.bf16.msra.mxu2 %v2145_v41  ;;  %v2469_v50 = vor.u32 %v2734_v47, %v2466_v48  ;;  %v2649_v51 = vld [vmem:[#allocation7 + $0x204] sm:$0xf0]  ;;  %v2424_v52 = vld [vmem:[#allocation7 + $0x460] sm:$0xf]  ;;  %v2644_v56 = vld [vmem:[#allocation7 + $0x1e4] sm:$0xf] }
  0x25   :  { %v2729_v53 = vld [vmem:[#allocation7 + $0x484] sm:$0xf0]  ;;  %1261 = vmatpush.bf16.msra.mxu3 %v2465_v45  ;;  %v2105_v54 = vor.u32 %v2649_v51, %v2104_v49  ;;  %v2106_v57 = vld [vmem:[#allocation7 + $0x208] sm:$0xf0]  ;;  %v2724_v58 = vld [vmem:[#allocation7 + $0x464] sm:$0xf] }
  0x26   :  { %v2425_v55 = vor.u32 %v2729_v53, %v2424_v52  ;;  %v96_v59 = vld [vmem:[#allocation10] sm:$0x77]  ;;  %v2109_v60 = vor.u32 %v2644_v56, %v2106_v57  ;;  %v2426_v61 = vld [vmem:[#allocation7 + $0x488] sm:$0xf0]  ;;  %v2064_v62 = vld [vmem:[#allocation7 + $0x190] sm:$0xf] }
  0x27   :  { %191 = vmatpush.bf16.msra.mxu0 %v1831_v22  ;;  %v2639_v63 = vld [vmem:[#allocation7 + $0x1b4] sm:$0xf0]  ;;  %v2429_v0 = vor.u32 %v2724_v58, %v2426_v61  ;;  %v2384_v1 = vld [vmem:[#allocation7 + $0x410] sm:$0xf]  ;;  %v2634_v3 = vld [vmem:[#allocation7 + $0x194] sm:$0xf] }
  0x28   :  { %204 = vmatpush.bf16.msra.mxu1 %v1835_v23  ;;  %v2719_v2 = vld [vmem:[#allocation7 + $0x434] sm:$0xf0]  ;;  %1249 = vmatpush.bf16.msra.mxu2 %v2105_v54  ;;  %v2065_v4 = vor.u32 %v2639_v63, %v2064_v62  ;;  %v2066_v5 = vld [vmem:[#allocation7 + $0x1b8] sm:$0xf0]  ;;  %v2714_v6 = vld [vmem:[#allocation7 + $0x414] sm:$0xf] }
  0x29   :  { %v2386_v7 = vld [vmem:[#allocation7 + $0x438] sm:$0xf0]  ;;  %1262 = vmatpush.bf16.msra.mxu3 %v2425_v55  ;;  %v2385_v8 = vor.u32 %v2719_v2, %v2384_v1  ;;  %v2069_v9 = vor.u32 %v2634_v3, %v2066_v5  ;;  %v2024_v10 = vld [vmem:[#allocation7 + $0x140] sm:$0xf]  ;;  %v2629_v11 = vld [vmem:[#allocation7 + $0x164] sm:$0xf0] }
  0x2a   :  { %v2344_v12 = vld [vmem:[#allocation7 + $0x3c0] sm:$0xf]  ;;  %v2389_v13 = vor.u32 %v2714_v6, %v2386_v7  ;;  %v2709_v14 = vld [vmem:[#allocation7 + $0x3e4] sm:$0xf0]  ;;  %v2624_v15 = vld [vmem:[#allocation7 + $0x144] sm:$0xf]  ;;  %v2025_v21 = vor.u32 %v2629_v11, %v2024_v10 }
  0x2b   :  { %192 = vmatpush.bf16.msra.mxu0 %v1823_v28  ;;  %v2026_v16 = vld [vmem:[#allocation7 + $0x168] sm:$0xf0]  ;;  %v116_v17 = vperm.slane %v96_v59, 0  ;;  %v2704_v18 = vld [vmem:[#allocation7 + $0x3c4] sm:$0xf]  ;;  %v117_v20 = vperm.slane %v96_v59, 4  ;;  %v2345_v22 = vor.u32 %v2709_v14, %v2344_v12 }
  0x2c   :  { %205 = vmatpush.bf16.msra.mxu1 %v1827_v29  ;;  %v2346_v19 = vld [vmem:[#allocation7 + $0x3e8] sm:$0xf0]  ;;  %1250 = vmatpush.bf16.msra.mxu2 %v2065_v4  ;;  %v2029_v23 = vor.u32 %v2624_v15, %v2026_v16  ;;  %v1984_v24 = vld [vmem:[#allocation7 + $0xf0] sm:$0xf]  ;;  %v2619_v25 = vld [vmem:[#allocation7 + $0x114] sm:$0xf0] }
  0x2d   :  { %1263 = vmatpush.bf16.msra.mxu3 %v2385_v8  ;;  %v2304_v26 = vld [vmem:[#allocation7 + $0x370] sm:$0xf]  ;;  %v2349_v27 = vor.u32 %v2704_v18, %v2346_v19  ;;  %v2699_v28 = vld [vmem:[#allocation7 + $0x394] sm:$0xf0]  ;;  %v2614_v29 = vld [vmem:[#allocation7 + $0xf4] sm:$0xf]  ;;  %v1985_v35 = vor.u32 %v2619_v25, %v1984_v24 }
  0x2e   :  { %v1986_v30 = vld [vmem:[#allocation7 + $0x118] sm:$0xf0]  ;;  %v120_v31 = vperm.slane %v116_v17, 0  ;;  %v2694_v32 = vld [vmem:[#allocation7 + $0x374] sm:$0xf]  ;;  %v2965_v25 = vmov 256.0  }
  0x2f   :  { %193 = vmatpush.bf16.msra.mxu0 %v1815_v34  ;;  %v2306_v33 = vld [vmem:[#allocation7 + $0x398] sm:$0xf0]  ;;  %v121_v34 = vperm.slane %v117_v20, 0  ;;  %v1944_v53 = vld [vmem:[#allocation7 + $0xa0] sm:$0xf]  ;;  %2773 = vrcp.f32 %v2965_v25  ;;  %s2966_s2 = smov [#allocation11]  }
  0x30   :  { %206 = vmatpush.bf16.msra.mxu1 %v1819_v36  ;;  %1251 = vmatpush.bf16.msra.mxu2 %v2025_v21  ;;  %v2305_v36 = vor.u32 %v2699_v28, %v2304_v26  ;;  %v2309_v39 = vor.u32 %v2694_v32, %v2306_v33  ;;  %v2609_v54 = vld [vmem:[#allocation7 + $0xc4] sm:$0xf0]  ;;  %v2264_v55 = vld [vmem:[#allocation7 + $0x320] sm:$0xf]  ;;  %v2604_v58 = vld [vmem:[#allocation7 + $0xa4] sm:$0xf] }
  0x31   :  { %1264 = vmatpush.bf16.msra.mxu3 %v2345_v22  ;;  %v1945_v56 = vor.u32 %v2609_v54, %v1944_v53  ;;  %v2689_v57 = vld [vmem:[#allocation7 + $0x344] sm:$0xf0]  ;;  %v1946_v59 = vld [vmem:[#allocation7 + $0xc8] sm:$0xf0]  ;;  %v2684_v62 = vld [vmem:[#allocation7 + $0x324] sm:$0xf] }
  0x32   :  { %1860 = vmatmul.msk.bf16.vlgmr.msra.gmra.mxu0 %vm182_vm0, %v102_v37  ;;  %v1949_v61 = vor.u32 %v2604_v58, %v1946_v59  ;;  %v2266_v63 = vld [vmem:[#allocation7 + $0x348] sm:$0xf0]  ;;  %v1904_v1 = vld [vmem:[#allocation7 + $0x50] sm:$0xf]  ;;  %v2599_v2 = vld [vmem:[#allocation7 + $0x74] sm:$0xf0] }
  0x33   :  { %1861 = vmatmul.msk.bf16.vlgmr.msra.gmra.mxu1 %vm182_vm0, %v102_v37  ;;  %1274 = vmatpush.bf16.msrb.mxu0 %v2149_v46  ;;  %v1989_v37 = vor.u32 %v2614_v29, %v1986_v30  ;;  %v2224_v3 = vld [vmem:[#allocation7 + $0x2d0] sm:$0xf]  ;;  %v1905_v4 = vor.u32 %v2599_v2, %v1904_v1  ;;  %v2679_v5 = vld [vmem:[#allocation7 + $0x2f4] sm:$0xf0]  ;;  %v2594_v6 = vld [vmem:[#allocation7 + $0x54] sm:$0xf] }
  0x34   :  { %1287 = vmatpush.bf16.msrb.mxu1 %v2469_v50  ;;  %1252 = vmatpush.bf16.msra.mxu2 %v1985_v35  ;;  %v1906_v7 = vld [vmem:[#allocation7 + $0x78] sm:$0xf0]  ;;  %v2225_v8 = vor.u32 %v2679_v5, %v2224_v3  ;;  %v2674_v10 = vld [vmem:[#allocation7 + $0x2d4] sm:$0xf]  ;;  %v2589_v14 = vld [vmem:[#allocation7 + $0x24] sm:$0xf0] }
  0x35   :  { %1265 = vmatpush.bf16.msra.mxu3 %v2305_v36  ;;  %v2226_v11 = vld [vmem:[#allocation7 + $0x2f8] sm:$0xf0]  ;;  %v2184_v15 = vld [vmem:[#allocation7 + $0x280] sm:$0xf]  ;;  %v2669_v17 = vld [vmem:[#allocation7 + $0x2a4] sm:$0xf0] }
  0x36   :  { %v2229_v12 = vor.u32 %v2674_v10, %v2226_v11  ;;  %v2584_v18 = vld [vmem:[#allocation7 + $0x4] sm:$0xf]  ;;  %v1866_v19 = vld [vmem:[#allocation7 + $0x28] sm:$0xf0]  ;;  %v2185_v20 = vor.u32 %v2669_v17, %v2184_v15  ;;  %v2152_v24 = vld [vmem:[#allocation7 + $0x238] sm:$0xf] }
  0x37   :  { %1275 = vmatpush.bf16.msrb.mxu0 %v2109_v60  ;;  %v2265_v60 = vor.u32 %v2689_v57, %v2264_v55  ;;  %v1869_v21 = vor.u32 %v2584_v18, %v1866_v19  ;;  %v2664_v22 = vld [vmem:[#allocation7 + $0x284] sm:$0xf]  ;;  %v2472_v28 = vld [vmem:[#allocation7 + $0x4b8] sm:$0xf]  ;;  %v2740_v29 = vld [vmem:[#allocation7 + $0x4dc] sm:$0xf0] }
  0x38   :  { %1288 = vmatpush.bf16.msrb.mxu1 %v2429_v0  ;;  %1253 = vmatpush.bf16.msra.mxu2 %v1945_v56  ;;  %v2269_v0 = vor.u32 %v2684_v62, %v2266_v63  ;;  %v2655_v32 = vld [vmem:[#allocation7 + $0x23c] sm:$0xf]  ;;  %v2154_v33 = vld [vmem:[#allocation7 + $0x260] sm:$0xf0]  ;;  %v2072_v53 = vld [vmem:[#allocation7 + $0x198] sm:$0xf] }
  0x39   :  { %1266 = vmatpush.bf16.msra.mxu3 %v2265_v60  ;;  %v2157_v35 = vor.u32 %v2655_v32, %v2154_v33  ;;  %v2474_v36 = vld [vmem:[#allocation7 + $0x4e0] sm:$0xf0]  ;;  %v2640_v54 = vld [vmem:[#allocation7 + $0x1bc] sm:$0xf0]  ;;  %v2392_v55 = vld [vmem:[#allocation7 + $0x418] sm:$0xf] }
  0x3a   :  { %v2073_v56 = vor.u32 %v2640_v54, %v2072_v53  ;;  %v2720_v57 = vld [vmem:[#allocation7 + $0x43c] sm:$0xf0]  ;;  %v2635_v58 = vld [vmem:[#allocation7 + $0x19c] sm:$0xf]  ;;  %v2074_v59 = vld [vmem:[#allocation7 + $0x1c0] sm:$0xf0] }
  0x3b   :  { %1276 = vmatpush.bf16.msrb.mxu0 %v2069_v9  ;;  %v1909_v9 = vor.u32 %v2594_v6, %v1906_v7  ;;  %v2393_v60 = vor.u32 %v2720_v57, %v2392_v55  ;;  %v2715_v62 = vld [vmem:[#allocation7 + $0x41c] sm:$0xf]  ;;  %v2394_v63 = vld [vmem:[#allocation7 + $0x440] sm:$0xf0]  ;;  %v2032_v2 = vld [vmem:[#allocation7 + $0x148] sm:$0xf] }
  0x3c   :  { %1289 = vmatpush.bf16.msrb.mxu1 %v2389_v13  ;;  %1254 = vmatpush.bf16.msra.mxu2 %v1905_v4  ;;  %v1864_v13 = vld [vmem:[#allocation7] sm:$0xf]  ;;  %v2397_v1 = vor.u32 %v2715_v62, %v2394_v63  ;;  %v2630_v3 = vld [vmem:[#allocation7 + $0x16c] sm:$0xf0]  ;;  %v2352_v4 = vld [vmem:[#allocation7 + $0x3c8] sm:$0xf] }
  0x3d   :  { %1267 = vmatpush.bf16.msra.mxu3 %v2225_v8  ;;  %v1865_v16 = vor.u32 %v2589_v14, %v1864_v13  ;;  %v2033_v5 = vor.u32 %v2630_v3, %v2032_v2  ;;  %v2710_v6 = vld [vmem:[#allocation7 + $0x3ec] sm:$0xf0]  ;;  %v2625_v7 = vld [vmem:[#allocation7 + $0x14c] sm:$0xf]  ;;  %v2034_v8 = vld [vmem:[#allocation7 + $0x170] sm:$0xf0] }
  0x3e   :  { %v2037_v10 = vor.u32 %v2625_v7, %v2034_v8  ;;  %v2705_v11 = vld [vmem:[#allocation7 + $0x3cc] sm:$0xf]  ;;  %v1992_v15 = vld [vmem:[#allocation7 + $0xf8] sm:$0xf]  ;;  %v2700_v19 = vld [vmem:[#allocation7 + $0x39c] sm:$0xf0] }
  0x3f   :  { %1277 = vmatpush.bf16.msrb.mxu0 %v2029_v23  ;;  %v2186_v23 = vld [vmem:[#allocation7 + $0x2a8] sm:$0xf0]  ;;  %v2312_v17 = vld [vmem:[#allocation7 + $0x378] sm:$0xf]  ;;  %v2314_v25 = vld [vmem:[#allocation7 + $0x3a0] sm:$0xf0] }
  0x40   :  { %1290 = vmatpush.bf16.msrb.mxu1 %v2349_v27  ;;  %1255 = vmatpush.bf16.msra.mxu2 %v1865_v16  ;;  %v2189_v26 = vor.u32 %v2664_v22, %v2186_v23  ;;  %v2660_v27 = vld [vmem:[#allocation7 + $0x25c] sm:$0xf0]  ;;  %v2313_v22 = vor.u32 %v2700_v19, %v2312_v17  ;;  %v2690_v32 = vld [vmem:[#allocation7 + $0x34c] sm:$0xf0]  ;;  %v2605_v33 = vld [vmem:[#allocation7 + $0xac] sm:$0xf] }
  0x41   :  { %1268 = vmatpush.bf16.msra.mxu3 %v2185_v20  ;;  %v2153_v30 = vor.u32 %v2660_v27, %v2152_v24  ;;  %v2620_v16 = vld [vmem:[#allocation7 + $0x11c] sm:$0xf0]  ;;  %v2615_v20 = vld [vmem:[#allocation7 + $0xfc] sm:$0xf]  ;;  %v2234_v55 = vld [vmem:[#allocation7 + $0x300] sm:$0xf0] }
  0x42   :  { %v1993_v18 = vor.u32 %v2620_v16, %v1992_v15  ;;  %v2695_v24 = vld [vmem:[#allocation7 + $0x37c] sm:$0xf]  ;;  %v2670_v62 = vld [vmem:[#allocation7 + $0x2ac] sm:$0xf0]  ;;  %v2585_v63 = vld [vmem:[#allocation7 + $0xc] sm:$0xf] }
  0x43   :  { %1278 = vmatpush.bf16.msrb.mxu0 %v1989_v37  ;;  %v2112_v37 = vld [vmem:[#allocation7 + $0x1e8] sm:$0xf]  ;;  %v2317_v27 = vor.u32 %v2695_v24, %v2314_v25  ;;  %v2675_v54 = vld [vmem:[#allocation7 + $0x2dc] sm:$0xf]  ;;  %v2656_v25 = vld [vmem:[#allocation7 + $0x244] sm:$0xf] }
  0x44   :  { %1291 = vmatpush.bf16.msrb.mxu1 %v2309_v39  ;;  %1300 = vmatpush.bf16.msrb.mxu2 %v2153_v30  ;;  %v2272_v30 = vld [vmem:[#allocation7 + $0x328] sm:$0xf]  ;;  %v2237_v57 = vor.u32 %v2675_v54, %v2234_v55  ;;  %v2636_v54 = vld [vmem:[#allocation7 + $0x1a4] sm:$0xf]  ;;  %v2082_v55 = vld [vmem:[#allocation7 + $0x1c8] sm:$0xf0] }
  0x45   :  { %v2741_v24 = vld [vmem:[#allocation7 + $0x4e4] sm:$0xf0]  ;;  %s1798_s4 = sshll.u32 %s2966_s2, 4  ;;  %s1800_s23 = sshll.u32 %s3153_s5, 4  ;;  %s1799_s4 = int_to_ptr.vmem [resolvable:$true] %s1798_s4  ;;  %s1801_s23 = int_to_ptr.hbm [resolvable:$true] %s1800_s23 }
  0x47   :  { %1279 = vmatpush.bf16.msrb.mxu0 %v1949_v61  ;;  %v2077_v61 = vor.u32 %v2635_v58, %v2074_v59  ;;  %v1872_v58 = vld [vmem:[#allocation7 + $0x8] sm:$0xf]  ;;  %v2590_v59 = vld [vmem:[#allocation7 + $0x2c] sm:$0xf0] }
  0x48   :  { %1292 = vmatpush.bf16.msrb.mxu1 %v2269_v0 }
  0x4b   :  { %1280 = vmatpush.bf16.msrb.mxu0 %v1909_v9  ;;  %v2353_v9 = vor.u32 %v2710_v6, %v2352_v4  ;;  %v2665_v4 = vld [vmem:[#allocation7 + $0x28c] sm:$0xf] }
  0x4c   :  { %1293 = vmatpush.bf16.msrb.mxu1 %v2229_v12  ;;  %v2354_v12 = vld [vmem:[#allocation7 + $0x3f0] sm:$0xf0] }
  0x4d   :  { %v2357_v14 = vor.u32 %v2705_v11, %v2354_v12 }
  0x4f   :  { %1281 = vmatpush.bf16.msrb.mxu0 %v1869_v21  ;;  %v1994_v21 = vld [vmem:[#allocation7 + $0x120] sm:$0xf0] }
  0x50   :  { %1294 = vmatpush.bf16.msrb.mxu1 %v2189_v26  ;;  %v1997_v23 = vor.u32 %v2615_v20, %v1994_v21  ;;  %v2160_v20 = vld [vmem:[#allocation7 + $0x240] sm:$0xf]  ;;  %v2661_v21 = vld [vmem:[#allocation7 + $0x264] sm:$0xf0] }
  0x53   :  { %1326 = vmatpush.bf16.msra.mxu0 %v2157_v35  ;;  %v2273_v35 = vor.u32 %v2690_v32, %v2272_v30  ;;  %v2482_v30 = vld [vmem:[#allocation7 + $0x4e8] sm:$0xf0] }
  0xaf   :  { %v195_v38 = vpop.f32.mrf.mxu0 }
  0xb0   :  { %v3012_v40 = vadd.f32 %v195_v38, %v120_v31  ;;  %v208_v41 = vpop.f32.mrf.mxu1  ;;  %v2473_v31 = vor.u32 %v2740_v29, %v2472_v28  ;;  %v2650_v38 = vld [vmem:[#allocation7 + $0x20c] sm:$0xf0]  ;;  %v1952_v28 = vld [vmem:[#allocation7 + $0xa8] sm:$0xf] }
  0xb1   :  { %v3014_v42 = vadd.f32 %v208_v41, %v121_v34  ;;  %v2735_v34 = vld [vmem:[#allocation7 + $0x4bc] sm:$0xf]  ;;  %v2113_v41 = vor.u32 %v2650_v38, %v2112_v37  ;;  %v2610_v29 = vld [vmem:[#allocation7 + $0xcc] sm:$0xf0]  ;;  %v2685_v37 = vld [vmem:[#allocation7 + $0x32c] sm:$0xf] }
  0xb2   :  { %v213_v43 = vsel %vm212_vm1, %v3012_v40, 0.0  ;;  %v226_v46 = vmul.f32 %v3012_v40, %v3012_v40  ;;  %1313 = vmatpush.bf16.msrb.mxu3 %v2473_v31  ;;  %v2477_v39 = vor.u32 %v2735_v34, %v2474_v36  ;;  %v1953_v31 = vor.u32 %v2610_v29, %v1952_v28  ;;  %v1954_v34 = vld [vmem:[#allocation7 + $0xd0] sm:$0xf0]  ;;  %v2162_v28 = vld [vmem:[#allocation7 + $0x268] sm:$0xf0] }
  0xb3   :  { %v214_v44 = vsel %vm212_vm1, %v3014_v42, 0.0  ;;  %v227_v47 = vmul.f32 %v3014_v42, %v3014_v42  ;;  %1301 = vmatpush.bf16.msrb.mxu2 %v2113_v41  ;;  %v1957_v36 = vor.u32 %v2605_v33, %v1954_v34  ;;  %v2274_v38 = vld [vmem:[#allocation7 + $0x350] sm:$0xf0]  ;;  %v2736_v29 = vld [vmem:[#allocation7 + $0x4c4] sm:$0xf] }
  0xb4   :  { %v215_v45 = vadd.f32 %v214_v44, %v213_v43  ;;  %v228_v50 = vsel %vm212_vm1, %v226_v46, 0.0  ;;  %v2432_v43 = vld [vmem:[#allocation7 + $0x468] sm:$0xf]  ;;  %v2730_v44 = vld [vmem:[#allocation7 + $0x48c] sm:$0xf0]  ;;  %1339 = vmatpush.bf16.msra.mxu1 %v2477_v39  ;;  %v2277_v41 = vor.u32 %v2685_v37, %v2274_v38 }
  0xb5   :  { %v229_v51 = vsel %vm212_vm1, %v227_v47, 0.0  ;;  %v2433_v46 = vor.u32 %v2730_v44, %v2432_v43  ;;  %v2114_v47 = vld [vmem:[#allocation7 + $0x210] sm:$0xf0]  ;;  %v1912_v43 = vld [vmem:[#allocation7 + $0x58] sm:$0xf] }
  0xb6   :  { %216 = vadd.xlane.f32.xlu0 %v215_v45  ;;  %v230_v52 = vadd.f32 %v229_v51, %v228_v50  ;;  %v2645_v45 = vld [vmem:[#allocation7 + $0x1ec] sm:$0xf]  ;;  %v2600_v44 = vld [vmem:[#allocation7 + $0x7c] sm:$0xf0]  ;;  %v2120_v33 = vld [vmem:[#allocation7 + $0x1f0] sm:$0xf] }
  0xb7   :  { %v197_v48 = vpop.f32.mrf.mxu0  ;;  %v2117_v50 = vor.u32 %v2645_v45, %v2114_v47  ;;  %1314 = vmatpush.bf16.msrb.mxu3 %v2433_v46  ;;  %1302 = vmatpush.bf16.msrb.mxu2 %v2073_v56  ;;  %v2232_v45 = vld [vmem:[#allocation7 + $0x2d8] sm:$0xf]  ;;  %v1913_v47 = vor.u32 %v2600_v44, %v1912_v43  ;;  %v2440_v37 = vld [vmem:[#allocation7 + $0x470] sm:$0xf]  ;;  %v2726_v43 = vld [vmem:[#allocation7 + $0x474] sm:$0xf] }
  0xb8   :  { %v210_v49 = vpop.f32.mrf.mxu1  ;;  %v2725_v48 = vld [vmem:[#allocation7 + $0x46c] sm:$0xf]  ;;  %v2651_v34 = vld [vmem:[#allocation7 + $0x214] sm:$0xf0]  ;;  %v2442_v44 = vld [vmem:[#allocation7 + $0x498] sm:$0xf0] }
  0xb9   :  { %v2434_v49 = vld [vmem:[#allocation7 + $0x490] sm:$0xf0]  ;;  %1327 = vmatpush.bf16.msra.mxu0 %v2117_v50  ;;  %v1914_v50 = vld [vmem:[#allocation7 + $0x80] sm:$0xf0]  ;;  %v2731_v38 = vld [vmem:[#allocation7 + $0x494] sm:$0xf0] }
  0xba   :  { %v2437_v51 = vor.u32 %v2725_v48, %v2434_v49  ;;  %v2680_v48 = vld [vmem:[#allocation7 + $0x2fc] sm:$0xf0]  ;;  %v2595_v49 = vld [vmem:[#allocation7 + $0x5c] sm:$0xf] }
  0xbb   :  { %1315 = vmatpush.bf16.msrb.mxu3 %v2393_v60  ;;  %1303 = vmatpush.bf16.msrb.mxu2 %v2033_v5  ;;  %v1917_v53 = vor.u32 %v2595_v49, %v1914_v50  ;;  %v2192_v60 = vld [vmem:[#allocation7 + $0x288] sm:$0xf]  ;;  %v2194_v5 = vld [vmem:[#allocation7 + $0x2b0] sm:$0xf0]  ;;  %v2445_v50 = vor.u32 %v2726_v43, %v2442_v44  ;;  %v2676_v43 = vld [vmem:[#allocation7 + $0x2e4] sm:$0xf] }
  0xbc   :  { %1340 = vmatpush.bf16.msra.mxu1 %v2437_v51  ;;  %v2233_v51 = vor.u32 %v2680_v48, %v2232_v45  ;;  %v2193_v2 = vor.u32 %v2670_v62, %v2192_v60  ;;  %v2197_v6 = vor.u32 %v2665_v4, %v2194_v5  ;;  %v2121_v45 = vor.u32 %v2651_v34, %v2120_v33  ;;  %v2641_v48 = vld [vmem:[#allocation7 + $0x1c4] sm:$0xf0]  ;;  %v2040_v60 = vld [vmem:[#allocation7 + $0x150] sm:$0xf]  ;;  %v2706_v4 = vld [vmem:[#allocation7 + $0x3d4] sm:$0xf] }
  0xbd   :  { %1328 = vmatpush.bf16.msra.mxu0 %v2077_v61  ;;  %v1873_v61 = vor.u32 %v2590_v59, %v1872_v58  ;;  %v2085_v62 = vor.u32 %v2636_v54, %v2082_v55  ;;  %v2362_v5 = vld [vmem:[#allocation7 + $0x3f8] sm:$0xf0]  ;;  %v1920_v33 = vld [vmem:[#allocation7 + $0x60] sm:$0xf]  ;;  %v2601_v34 = vld [vmem:[#allocation7 + $0x84] sm:$0xf0] }
  0xbe   :  { %231 = vadd.xlane.f32.xlu0 %v230_v52  ;;  %v3026_v52 = vpop.eup %2773  ;;  %v2242_v44 = vld [vmem:[#allocation7 + $0x308] sm:$0xf0]  ;;  %v2586_v54 = vld [vmem:[#allocation7 + $0x14] sm:$0xf]  ;;  %v1882_v55 = vld [vmem:[#allocation7 + $0x38] sm:$0xf0] }
  0xbf   :  { %v219_v0 = vmul.f32 256.0, %v3026_v52  ;;  %1316 = vmatpush.bf16.msrb.mxu3 %v2353_v9  ;;  %1304 = vmatpush.bf16.msrb.mxu2 %v1993_v18  ;;  %vm223_vm2 = vweird.f32 %v3026_v52 }
  0xc0   :  { %1341 = vmatpush.bf16.msra.mxu1 %v2397_v1 }
  0xc1   :  { %v220_v13 = vsub.f32 1.0, %v219_v0  ;;  %1329 = vmatpush.bf16.msra.mxu0 %v2037_v10  ;;  %v1874_v0 = vld [vmem:[#allocation7 + $0x30] sm:$0xf0] }
  0xc2   :  { %v1877_v3 = vor.u32 %v2585_v63, %v1874_v0  ;;  %v2360_v0 = vld [vmem:[#allocation7 + $0x3d0] sm:$0xf] }
  0xc3   :  { %v221_v26 = vmul.f32 %v3026_v52, %v220_v13  ;;  %1317 = vmatpush.bf16.msrb.mxu3 %v2313_v22  ;;  %1305 = vmatpush.bf16.msrb.mxu2 %v1953_v31 }
  0xc4   :  { %1342 = vmatpush.bf16.msra.mxu1 %v2357_v14 }
  0xc5   :  { %1330 = vmatpush.bf16.msra.mxu0 %v1997_v23  ;;  %v222_v39 = vadd.f32 %v3026_v52, %v221_v26  ;;  %v2480_v23 = vld [vmem:[#allocation7 + $0x4c0] sm:$0xf] }
  0xc6   :  { %v2481_v32 = vor.u32 %v2741_v24, %v2480_v23  ;;  %v2280_v23 = vld [vmem:[#allocation7 + $0x330] sm:$0xf]  ;;  %v2691_v24 = vld [vmem:[#allocation7 + $0x354] sm:$0xf0] }
  0xc7   :  { %1318 = vmatpush.bf16.msrb.mxu3 %v2273_v35  ;;  %v224_v56 = vsel %vm223_vm2, %v3026_v52, %v222_v39  ;;  %1306 = vmatpush.bf16.msrb.mxu2 %v1913_v47  ;;  %v2165_v35 = vor.u32 %v2656_v25, %v2162_v28  ;;  %v2646_v39 = vld [vmem:[#allocation7 + $0x1f4] sm:$0xf]  ;;  %v2080_v47 = vld [vmem:[#allocation7 + $0x1a0] sm:$0xf]  ;;  %v1962_v28 = vld [vmem:[#allocation7 + $0xd8] sm:$0xf0] }
  0xc8   :  { %1343 = vmatpush.bf16.msra.mxu1 %v2317_v27  ;;  %v2081_v58 = vor.u32 %v2641_v48, %v2080_v47  ;;  %v2606_v25 = vld [vmem:[#allocation7 + $0xb4] sm:$0xf]  ;;  %v2591_v48 = vld [vmem:[#allocation7 + $0x34] sm:$0xf0] }
  0xc9   :  { %1331 = vmatpush.bf16.msra.mxu0 %v1957_v36  ;;  %v2485_v36 = vor.u32 %v2736_v29, %v2482_v30  ;;  %v2686_v29 = vld [vmem:[#allocation7 + $0x334] sm:$0xf]  ;;  %v2282_v30 = vld [vmem:[#allocation7 + $0x358] sm:$0xf0] }
  0xcb   :  { %1319 = vmatpush.bf16.msrb.mxu3 %v2233_v51  ;;  %1307 = vmatpush.bf16.msrb.mxu2 %v1873_v61  ;;  %v2400_v51 = vld [vmem:[#allocation7 + $0x420] sm:$0xf]  ;;  %v2631_v61 = vld [vmem:[#allocation7 + $0x174] sm:$0xf0] }
  0xcc   :  { %1344 = vmatpush.bf16.msra.mxu1 %v2277_v41  ;;  %v2122_v41 = vld [vmem:[#allocation7 + $0x218] sm:$0xf0] }
  0xcd   :  { %1332 = vmatpush.bf16.msra.mxu0 %v1917_v53  ;;  %v2125_v49 = vor.u32 %v2646_v39, %v2122_v41  ;;  %v2721_v53 = vld [vmem:[#allocation7 + $0x444] sm:$0xf0]  ;;  %v2596_v39 = vld [vmem:[#allocation7 + $0x64] sm:$0xf]  ;;  %v1922_v41 = vld [vmem:[#allocation7 + $0x88] sm:$0xf0] }
  0xce   :  { %v2401_v59 = vor.u32 %v2721_v53, %v2400_v51  ;;  %v1925_v51 = vor.u32 %v2596_v39, %v1922_v41  ;;  %v2245_v53 = vor.u32 %v2676_v43, %v2242_v44  ;;  %v2627_v39 = vld [vmem:[#allocation7 + $0x15c] sm:$0xf]  ;;  %v2050_v41 = vld [vmem:[#allocation7 + $0x180] sm:$0xf0] }
  0xcf   :  { %1320 = vmatpush.bf16.msrb.mxu3 %v2193_v2  ;;  %v2626_v2 = vld [vmem:[#allocation7 + $0x154] sm:$0xf]  ;;  %v2707_v43 = vld [vmem:[#allocation7 + $0x3dc] sm:$0xf]  ;;  %v2370_v44 = vld [vmem:[#allocation7 + $0x400] sm:$0xf0] }
  0xd0   :  { %1345 = vmatpush.bf16.msra.mxu1 %v2237_v57  ;;  %v2402_v57 = vld [vmem:[#allocation7 + $0x448] sm:$0xf0] }
  0xd1   :  { %1333 = vmatpush.bf16.msra.mxu0 %v1877_v3  ;;  %v2042_v3 = vld [vmem:[#allocation7 + $0x178] sm:$0xf0] }
  0xd4   :  { %1346 = vmatpush.bf16.msra.mxu1 %v2197_v6  ;;  %v2041_v6 = vor.u32 %v2631_v61, %v2040_v60  ;;  %v2488_v60 = vld [vmem:[#allocation7 + $0x4c8] sm:$0xf]  ;;  %v2742_v61 = vld [vmem:[#allocation7 + $0x4ec] sm:$0xf0] }
 0x129   :  { %v217_v46 = vpop.xlane.xlu0 %216 }
 0x12a   :  { %v225_v1 = vmul.f32 %v224_v56, %v217_v46  ;;  %v2441_v46 = vor.u32 %v2731_v38, %v2440_v37  ;;  %v2240_v37 = vld [vmem:[#allocation7 + $0x2e0] sm:$0xf]  ;;  %v2681_v38 = vld [vmem:[#allocation7 + $0x304] sm:$0xf0] }
 0x12b   :  { %v2241_v47 = vor.u32 %v2681_v38, %v2240_v37  ;;  %v2368_v37 = vld [vmem:[#allocation7 + $0x3d8] sm:$0xf]  ;;  %v2712_v38 = vld [vmem:[#allocation7 + $0x3fc] sm:$0xf0] }
 0x12c   :  { %v234_v7 = vmul.f32 %v225_v1, %v225_v1  ;;  %v237_v18 = vsub.f32 %v3012_v40, %v225_v1  ;;  %v238_v19 = vsub.f32 %v3014_v42, %v225_v1  ;;  %v2161_v42 = vor.u32 %v2661_v21, %v2160_v20  ;;  %v2711_v1 = vld [vmem:[#allocation7 + $0x3f4] sm:$0xf0] }
 0x12d   :  { %v2611_v20 = vld [vmem:[#allocation7 + $0xd4] sm:$0xf0] }
 0x131   :  { %v232_v52 = vpop.xlane.xlu0 %231 }
 0x132   :  { %v233_v8 = vmul.f32 %v232_v52, %v224_v56  ;;  %v2716_v56 = vld [vmem:[#allocation7 + $0x424] sm:$0xf]  ;;  %v2361_v52 = vor.u32 %v2711_v1, %v2360_v0  ;;  %v2170_v1 = vld [vmem:[#allocation7 + $0x270] sm:$0xf0] }
 0x133   :  { %v2405_v63 = vor.u32 %v2716_v56, %v2402_v57  ;;  %v2666_v56 = vld [vmem:[#allocation7 + $0x294] sm:$0xf]  ;;  %v2202_v57 = vld [vmem:[#allocation7 + $0x2b8] sm:$0xf0] }
 0x134   :  { %v235_v9 = vsub.f32 %v233_v8, %v234_v7  ;;  %v2000_v7 = vld [vmem:[#allocation7 + $0x100] sm:$0xf]  ;;  %v2621_v8 = vld [vmem:[#allocation7 + $0x124] sm:$0xf0] }
 0x136   :  { %v236_v10 = vmax.f32 %v235_v9, 0.0  ;;  %v2045_v9 = vor.u32 %v2626_v2, %v2042_v3  ;;  %v2737_v2 = vld [vmem:[#allocation7 + $0x4cc] sm:$0xf]  ;;  %v2490_v3 = vld [vmem:[#allocation7 + $0x4f0] sm:$0xf0] }
 0x138   :  { %v239_v11 = vadd.f32 1e-05, %v236_v10  ;;  %v2365_v10 = vor.u32 %v2706_v4, %v2362_v5  ;;  %v1885_v4 = vor.u32 %v2586_v54, %v1882_v55  ;;  %v2205_v5 = vor.u32 %v2666_v56, %v2202_v57  ;;  %v2617_v54 = vld [vmem:[#allocation7 + $0x10c] sm:$0xf]  ;;  %v2010_v55 = vld [vmem:[#allocation7 + $0x130] sm:$0xf0] }
 0x139   :  { %v2697_v56 = vld [vmem:[#allocation7 + $0x38c] sm:$0xf]  ;;  %v2330_v57 = vld [vmem:[#allocation7 + $0x3b0] sm:$0xf0] }
 0x13a   :  { %2775 = vrsqrt.f32 %v239_v11  ;;  %vm246_vm4 = vweird.f32 %v239_v11 }
 0x140   :  { %v2776_v12 = vpop.eup %2775 }
 0x141   :  { %v241_v13 = vmul.f32 %v2776_v12, %v239_v11  ;;  %vm247_vm3 = vweird.f32 %v2776_v12  ;;  %v2320_v11 = vld [vmem:[#allocation7 + $0x380] sm:$0xf] }
 0x142   :  { %vm248_vm5 = vmor %vm246_vm4, %vm247_vm3 }
 0x143   :  { %v242_v14 = vmul.f32 %v2776_v12, %v241_v13  ;;  %v2616_v13 = vld [vmem:[#allocation7 + $0x104] sm:$0xf] }
 0x145   :  { %v243_v15 = vmul.f32 0.5, %v242_v14  ;;  %v2002_v14 = vld [vmem:[#allocation7 + $0x128] sm:$0xf0] }
 0x146   :  { %v2005_v21 = vor.u32 %v2616_v13, %v2002_v14  ;;  %v2647_v13 = vld [vmem:[#allocation7 + $0x1fc] sm:$0xf]  ;;  %v2130_v14 = vld [vmem:[#allocation7 + $0x220] sm:$0xf0] }
 0x147   :  { %v244_v16 = vsub.f32 1.5, %v243_v15  ;;  %v2696_v15 = vld [vmem:[#allocation7 + $0x384] sm:$0xf] }
 0x149   :  { %v245_v17 = vmul.f32 %v2776_v12, %v244_v16  ;;  %v2322_v16 = vld [vmem:[#allocation7 + $0x3a8] sm:$0xf0] }
 0x14b   :  { %v249_v22 = vsel %vm248_vm5, %v2776_v12, %v245_v17  ;;  %v2701_v12 = vld [vmem:[#allocation7 + $0x3a4] sm:$0xf0]  ;;  %v2001_v17 = vor.u32 %v2621_v8, %v2000_v7  ;;  %v2128_v7 = vld [vmem:[#allocation7 + $0x1f8] sm:$0xf]  ;;  %v2652_v8 = vld [vmem:[#allocation7 + $0x21c] sm:$0xf0] }
 0x14c   :  { %v3037_v26 = vmul.f32 %v249_v22, %v237_v18  ;;  %v3039_v27 = vmul.f32 %v249_v22, %v238_v19  ;;  %v2321_v18 = vor.u32 %v2701_v12, %v2320_v11  ;;  %v1960_v19 = vld [vmem:[#allocation7 + $0xb0] sm:$0xf]  ;;  %v2325_v22 = vor.u32 %v2696_v15, %v2322_v16  ;;  %v2448_v11 = vld [vmem:[#allocation7 + $0x478] sm:$0xf]  ;;  %v2732_v12 = vld [vmem:[#allocation7 + $0x49c] sm:$0xf0] }
 0x14d   :  { %v2727_v15 = vld [vmem:[#allocation7 + $0x47c] sm:$0xf]  ;;  %v2450_v16 = vld [vmem:[#allocation7 + $0x4a0] sm:$0xf0] }
 0x14e   :  { %v3043_v31 = vpack.c.bf16 %v3037_v26, %v3037_v26  ;;  %v3047_v40 = vpack.c.bf16 %v3039_v27, %v3039_v27 }
 0x150   :  { %1256 = vmatmul.bf16.vlgmr.msra.gmra.mxu2 %v3043_v31  ;;  %1269 = vmatmul.bf16.vlgmr.msra.gmra.mxu3 %v3047_v40 }
 0x151   :  { %1282 = vmatmul.bf16.vlgmr.msrb.gmra.mxu0 %v3043_v31  ;;  %1295 = vmatmul.bf16.vlgmr.msrb.gmra.mxu1 %v3047_v40 }
 0x152   :  { %1352 = vmatpush.bf16.msra.mxu2 %v2161_v42  ;;  %1365 = vmatpush.bf16.msra.mxu3 %v2481_v32  ;;  %v1961_v42 = vor.u32 %v2611_v20, %v1960_v19  ;;  %v2281_v32 = vor.u32 %v2691_v24, %v2280_v23  ;;  %v2088_v19 = vld [vmem:[#allocation7 + $0x1a8] sm:$0xf]  ;;  %v2642_v20 = vld [vmem:[#allocation7 + $0x1cc] sm:$0xf0] }
 0x153   :  { %1378 = vmatpush.bf16.msrb.mxu0 %v2165_v35  ;;  %1391 = vmatpush.bf16.msrb.mxu1 %v2485_v36  ;;  %v1965_v35 = vor.u32 %v2606_v25, %v1962_v28  ;;  %v2285_v36 = vor.u32 %v2686_v29, %v2282_v30  ;;  %v2408_v23 = vld [vmem:[#allocation7 + $0x428] sm:$0xf]  ;;  %v2722_v24 = vld [vmem:[#allocation7 + $0x44c] sm:$0xf0]  ;;  %v2637_v25 = vld [vmem:[#allocation7 + $0x1ac] sm:$0xf] }
 0x154   :  { %v2090_v28 = vld [vmem:[#allocation7 + $0x1d0] sm:$0xf0]  ;;  %v2717_v29 = vld [vmem:[#allocation7 + $0x42c] sm:$0xf] }
 0x155   :  { %v2410_v30 = vld [vmem:[#allocation7 + $0x450] sm:$0xf0] }
 0x156   :  { %1353 = vmatpush.bf16.msra.mxu2 %v2121_v45  ;;  %1366 = vmatpush.bf16.msra.mxu3 %v2441_v46  ;;  %v1880_v45 = vld [vmem:[#allocation7 + $0x10] sm:$0xf]  ;;  %v1921_v46 = vor.u32 %v2601_v34, %v1920_v33  ;;  %v2048_v33 = vld [vmem:[#allocation7 + $0x158] sm:$0xf]  ;;  %v2632_v34 = vld [vmem:[#allocation7 + $0x17c] sm:$0xf0] }
 0x157   :  { %1379 = vmatpush.bf16.msrb.mxu0 %v2125_v49  ;;  %1392 = vmatpush.bf16.msrb.mxu1 %v2445_v50  ;;  %v2200_v49 = vld [vmem:[#allocation7 + $0x290] sm:$0xf]  ;;  %v2671_v50 = vld [vmem:[#allocation7 + $0x2b4] sm:$0xf0] }
 0x158   :  { %v2201_v0 = vor.u32 %v2671_v50, %v2200_v49  ;;  %v2053_v49 = vor.u32 %v2627_v39, %v2050_v41  ;;  %v2373_v50 = vor.u32 %v2707_v43, %v2370_v44  ;;  %v2738_v39 = vld [vmem:[#allocation7 + $0x4d4] sm:$0xf]  ;;  %v2498_v41 = vld [vmem:[#allocation7 + $0x4f8] sm:$0xf0] }
 0x15a   :  { %1354 = vmatpush.bf16.msra.mxu2 %v2081_v58  ;;  %1367 = vmatpush.bf16.msra.mxu3 %v2401_v59  ;;  %v2168_v58 = vld [vmem:[#allocation7 + $0x248] sm:$0xf]  ;;  %v2662_v59 = vld [vmem:[#allocation7 + $0x26c] sm:$0xf0] }
 0x15b   :  { %1380 = vmatpush.bf16.msrb.mxu0 %v2085_v62  ;;  %1393 = vmatpush.bf16.msrb.mxu1 %v2405_v63  ;;  %v2657_v62 = vld [vmem:[#allocation7 + $0x24c] sm:$0xf]  ;;  %v1881_v63 = vor.u32 %v2591_v48, %v1880_v45  ;;  %v2049_v45 = vor.u32 %v2632_v34, %v2048_v33  ;;  %v2622_v48 = vld [vmem:[#allocation7 + $0x12c] sm:$0xf0]  ;;  %v2743_v34 = vld [vmem:[#allocation7 + $0x4f4] sm:$0xf0] }
 0x15c   :  { %v2496_v33 = vld [vmem:[#allocation7 + $0x4d0] sm:$0xf] }
 0x15e   :  { %1355 = vmatpush.bf16.msra.mxu2 %v2041_v6  ;;  %1368 = vmatpush.bf16.msra.mxu3 %v2361_v52  ;;  %v2169_v6 = vor.u32 %v2662_v59, %v2168_v58  ;;  %v2489_v52 = vor.u32 %v2742_v61, %v2488_v60  ;;  %v1968_v60 = vld [vmem:[#allocation7 + $0xb8] sm:$0xf]  ;;  %v2612_v61 = vld [vmem:[#allocation7 + $0xdc] sm:$0xf0] }
 0x15f   :  { %1381 = vmatpush.bf16.msrb.mxu0 %v2045_v9  ;;  %1394 = vmatpush.bf16.msrb.mxu1 %v2365_v10  ;;  %v2173_v9 = vor.u32 %v2657_v62, %v2170_v1  ;;  %v2493_v10 = vor.u32 %v2737_v2, %v2490_v3  ;;  %v2013_v62 = vor.u32 %v2617_v54, %v2010_v55  ;;  %v2692_v1 = vld [vmem:[#allocation7 + $0x35c] sm:$0xf0]  ;;  %v2607_v2 = vld [vmem:[#allocation7 + $0xbc] sm:$0xf]  ;;  %v1970_v3 = vld [vmem:[#allocation7 + $0xe0] sm:$0xf0] }
 0x160   :  { %1308 = vmatmul.bf16.vlgmr.msrb.gmra.mxu2 %v3043_v31  ;;  %1321 = vmatmul.bf16.vlgmr.msrb.gmra.mxu3 %v3047_v40  ;;  %v2648_v54 = vld [vmem:[#allocation7 + $0x204] sm:$0xf]  ;;  %v2138_v55 = vld [vmem:[#allocation7 + $0x228] sm:$0xf0] }
 0x161   :  { %1334 = vmatmul.bf16.vlgmr.msra.gmra.mxu0 %v3043_v31  ;;  %1347 = vmatmul.bf16.vlgmr.msra.gmra.mxu1 %v3047_v40 }
 0x162   :  { %1356 = vmatpush.bf16.msra.mxu2 %v2001_v17  ;;  %1369 = vmatpush.bf16.msra.mxu3 %v2321_v18  ;;  %v2129_v17 = vor.u32 %v2652_v8, %v2128_v7  ;;  %v2449_v18 = vor.u32 %v2732_v12, %v2448_v11  ;;  %v1928_v7 = vld [vmem:[#allocation7 + $0x68] sm:$0xf]  ;;  %v2602_v8 = vld [vmem:[#allocation7 + $0x8c] sm:$0xf0] }
 0x163   :  { %1382 = vmatpush.bf16.msrb.mxu0 %v2005_v21  ;;  %1395 = vmatpush.bf16.msrb.mxu1 %v2325_v22  ;;  %v2133_v21 = vor.u32 %v2647_v13, %v2130_v14  ;;  %v2453_v22 = vor.u32 %v2727_v15, %v2450_v16  ;;  %v2248_v11 = vld [vmem:[#allocation7 + $0x2e8] sm:$0xf]  ;;  %v2682_v12 = vld [vmem:[#allocation7 + $0x30c] sm:$0xf0]  ;;  %v2597_v13 = vld [vmem:[#allocation7 + $0x6c] sm:$0xf] }
 0x164   :  { %v1930_v14 = vld [vmem:[#allocation7 + $0x90] sm:$0xf0]  ;;  %v2677_v15 = vld [vmem:[#allocation7 + $0x2ec] sm:$0xf] }
 0x165   :  { %v2250_v16 = vld [vmem:[#allocation7 + $0x310] sm:$0xf0] }
 0x166   :  { %1357 = vmatpush.bf16.msra.mxu2 %v1961_v42  ;;  %1370 = vmatpush.bf16.msra.mxu3 %v2281_v32  ;;  %v2089_v42 = vor.u32 %v2642_v20, %v2088_v19  ;;  %v2409_v32 = vor.u32 %v2722_v24, %v2408_v23  ;;  %v2249_v19 = vor.u32 %v2682_v12, %v2248_v11  ;;  %v2592_v20 = vld [vmem:[#allocation7 + $0x3c] sm:$0xf0]  ;;  %v2713_v12 = vld [vmem:[#allocation7 + $0x404] sm:$0xf0] }
 0x167   :  { %1383 = vmatpush.bf16.msrb.mxu0 %v1965_v35  ;;  %1396 = vmatpush.bf16.msrb.mxu1 %v2285_v36  ;;  %v2093_v35 = vor.u32 %v2637_v25, %v2090_v28  ;;  %v2413_v36 = vor.u32 %v2717_v29, %v2410_v30  ;;  %v1933_v23 = vor.u32 %v2597_v13, %v1930_v14  ;;  %v2587_v25 = vld [vmem:[#allocation7 + $0x1c] sm:$0xf]  ;;  %v1890_v28 = vld [vmem:[#allocation7 + $0x40] sm:$0xf0]  ;;  %v2376_v11 = vld [vmem:[#allocation7 + $0x3e0] sm:$0xf] }
 0x168   :  { %v2253_v24 = vor.u32 %v2677_v15, %v2250_v16  ;;  %v2667_v29 = vld [vmem:[#allocation7 + $0x29c] sm:$0xf]  ;;  %v2210_v30 = vld [vmem:[#allocation7 + $0x2c0] sm:$0xf0]  ;;  %v1893_v43 = vor.u32 %v2587_v25, %v1890_v28  ;;  %v2058_v14 = vld [vmem:[#allocation7 + $0x188] sm:$0xf0] }
 0x169   :  { %v2213_v44 = vor.u32 %v2667_v29, %v2210_v30  ;;  %v2628_v13 = vld [vmem:[#allocation7 + $0x164] sm:$0xf]  ;;  %v2378_v16 = vld [vmem:[#allocation7 + $0x408] sm:$0xf0]  ;;  %v2618_v25 = vld [vmem:[#allocation7 + $0x114] sm:$0xf] }
 0x16a   :  { %1358 = vmatpush.bf16.msra.mxu2 %v1921_v46  ;;  %1371 = vmatpush.bf16.msra.mxu3 %v2241_v47  ;;  %v2369_v46 = vor.u32 %v2712_v38, %v2368_v37  ;;  %v2008_v47 = vld [vmem:[#allocation7 + $0x108] sm:$0xf]  ;;  %v2178_v38 = vld [vmem:[#allocation7 + $0x278] sm:$0xf0]  ;;  %v2708_v15 = vld [vmem:[#allocation7 + $0x3e4] sm:$0xf] }
 0x16b   :  { %1384 = vmatpush.bf16.msrb.mxu0 %v1925_v51  ;;  %1397 = vmatpush.bf16.msrb.mxu1 %v2245_v53  ;;  %v2328_v51 = vld [vmem:[#allocation7 + $0x388] sm:$0xf]  ;;  %v2702_v53 = vld [vmem:[#allocation7 + $0x3ac] sm:$0xf0]  ;;  %v2009_v58 = vor.u32 %v2622_v48, %v2008_v47  ;;  %v2136_v47 = vld [vmem:[#allocation7 + $0x200] sm:$0xf] }
 0x16c   :  { %v2329_v59 = vor.u32 %v2702_v53, %v2328_v51  ;;  %v2653_v48 = vld [vmem:[#allocation7 + $0x224] sm:$0xf0]  ;;  %v2456_v51 = vld [vmem:[#allocation7 + $0x480] sm:$0xf]  ;;  %v2018_v28 = vld [vmem:[#allocation7 + $0x138] sm:$0xf0] }
 0x16d   :  { %v2733_v53 = vld [vmem:[#allocation7 + $0x4a4] sm:$0xf0]  ;;  %v2698_v29 = vld [vmem:[#allocation7 + $0x394] sm:$0xf]  ;;  %v2338_v30 = vld [vmem:[#allocation7 + $0x3b8] sm:$0xf0] }
 0x16e   :  { %1359 = vmatpush.bf16.msra.mxu2 %v1881_v63  ;;  %1372 = vmatpush.bf16.msra.mxu3 %v2201_v0  ;;  %v2333_v63 = vor.u32 %v2697_v56, %v2330_v57  ;;  %v2288_v0 = vld [vmem:[#allocation7 + $0x338] sm:$0xf]  ;;  %v2728_v56 = vld [vmem:[#allocation7 + $0x484] sm:$0xf]  ;;  %v2458_v57 = vld [vmem:[#allocation7 + $0x4a8] sm:$0xf0] }
 0x16f   :  { %1385 = vmatpush.bf16.msrb.mxu0 %v1885_v4  ;;  %1398 = vmatpush.bf16.msrb.mxu1 %v2205_v5  ;;  %v2687_v4 = vld [vmem:[#allocation7 + $0x33c] sm:$0xf]  ;;  %v2290_v5 = vld [vmem:[#allocation7 + $0x360] sm:$0xf0] }
 0x171   :  { %1360 = vmatmul.bf16.vlgmr.msra.gmra.mxu2 %v3043_v31  ;;  %1373 = vmatmul.bf16.vlgmr.msra.gmra.mxu3 %v3047_v40 }
 0x172   :  { %1404 = vmatpush.bf16.msrb.mxu2 %v2169_v6  ;;  %1417 = vmatpush.bf16.msrb.mxu3 %v2489_v52  ;;  %v1969_v6 = vor.u32 %v2612_v61, %v1968_v60  ;;  %v2289_v52 = vor.u32 %v2692_v1, %v2288_v0  ;;  %v2096_v60 = vld [vmem:[#allocation7 + $0x1b0] sm:$0xf]  ;;  %v2643_v61 = vld [vmem:[#allocation7 + $0x1d4] sm:$0xf0] }
 0x173   :  { %1430 = vmatpush.bf16.msra.mxu0 %v2173_v9  ;;  %1443 = vmatpush.bf16.msra.mxu1 %v2493_v10  ;;  %v1973_v9 = vor.u32 %v2607_v2, %v1970_v3  ;;  %v2293_v10 = vor.u32 %v2687_v4, %v2290_v5  ;;  %v2416_v0 = vld [vmem:[#allocation7 + $0x430] sm:$0xf]  ;;  %v2723_v1 = vld [vmem:[#allocation7 + $0x454] sm:$0xf0]  ;;  %v2638_v2 = vld [vmem:[#allocation7 + $0x1b4] sm:$0xf] }
 0x174   :  { %1386 = vmatmul.bf16.vlgmr.msrb.gmra.mxu0 %v3043_v31  ;;  %1399 = vmatmul.bf16.vlgmr.msrb.gmra.mxu1 %v3047_v40  ;;  %v2098_v3 = vld [vmem:[#allocation7 + $0x1d8] sm:$0xf0]  ;;  %v2718_v4 = vld [vmem:[#allocation7 + $0x434] sm:$0xf] }
 0x175   :  { %v2418_v5 = vld [vmem:[#allocation7 + $0x458] sm:$0xf0] }
 0x176   :  { %1405 = vmatpush.bf16.msrb.mxu2 %v2129_v17  ;;  %1418 = vmatpush.bf16.msrb.mxu3 %v2449_v18  ;;  %v1888_v17 = vld [vmem:[#allocation7 + $0x18] sm:$0xf]  ;;  %v1929_v18 = vor.u32 %v2602_v8, %v1928_v7  ;;  %v2056_v7 = vld [vmem:[#allocation7 + $0x160] sm:$0xf]  ;;  %v2633_v8 = vld [vmem:[#allocation7 + $0x184] sm:$0xf0] }
 0x177   :  { %1431 = vmatpush.bf16.msra.mxu0 %v2133_v21  ;;  %1444 = vmatpush.bf16.msra.mxu1 %v2453_v22  ;;  %v2208_v21 = vld [vmem:[#allocation7 + $0x298] sm:$0xf]  ;;  %v2672_v22 = vld [vmem:[#allocation7 + $0x2bc] sm:$0xf0] }
 0x178   :  { %v2209_v37 = vor.u32 %v2672_v22, %v2208_v21  ;;  %v2061_v21 = vor.u32 %v2628_v13, %v2058_v14  ;;  %v2381_v22 = vor.u32 %v2708_v15, %v2378_v16 }
 0x17a   :  { %1406 = vmatpush.bf16.msrb.mxu2 %v2089_v42  ;;  %1419 = vmatpush.bf16.msrb.mxu3 %v2409_v32  ;;  %v2176_v42 = vld [vmem:[#allocation7 + $0x250] sm:$0xf]  ;;  %v2663_v32 = vld [vmem:[#allocation7 + $0x274] sm:$0xf0] }
 0x17b   :  { %1432 = vmatpush.bf16.msra.mxu0 %v2093_v35  ;;  %1445 = vmatpush.bf16.msra.mxu1 %v2413_v36  ;;  %v2658_v35 = vld [vmem:[#allocation7 + $0x254] sm:$0xf]  ;;  %v1889_v36 = vor.u32 %v2592_v20, %v1888_v17  ;;  %v2057_v17 = vor.u32 %v2633_v8, %v2056_v7  ;;  %v2623_v20 = vld [vmem:[#allocation7 + $0x134] sm:$0xf0] }
 0x17e   :  { %1407 = vmatpush.bf16.msrb.mxu2 %v2049_v45  ;;  %1420 = vmatpush.bf16.msrb.mxu3 %v2369_v46  ;;  %v2177_v45 = vor.u32 %v2663_v32, %v2176_v42  ;;  %v2497_v46 = vor.u32 %v2743_v34, %v2496_v33  ;;  %v1976_v33 = vld [vmem:[#allocation7 + $0xc0] sm:$0xf]  ;;  %v2613_v34 = vld [vmem:[#allocation7 + $0xe4] sm:$0xf0] }
 0x17f   :  { %1433 = vmatpush.bf16.msra.mxu0 %v2053_v49  ;;  %1446 = vmatpush.bf16.msra.mxu1 %v2373_v50  ;;  %v2181_v49 = vor.u32 %v2658_v35, %v2178_v38  ;;  %v2501_v50 = vor.u32 %v2738_v39, %v2498_v41  ;;  %v2021_v35 = vor.u32 %v2618_v25, %v2018_v28  ;;  %v2693_v38 = vld [vmem:[#allocation7 + $0x364] sm:$0xf0]  ;;  %v2608_v39 = vld [vmem:[#allocation7 + $0xc4] sm:$0xf]  ;;  %v1978_v41 = vld [vmem:[#allocation7 + $0xe8] sm:$0xf0] }
 0x182   :  { %1408 = vmatpush.bf16.msrb.mxu2 %v2009_v58  ;;  %1421 = vmatpush.bf16.msrb.mxu3 %v2329_v59  ;;  %v2137_v58 = vor.u32 %v2653_v48, %v2136_v47  ;;  %v2457_v59 = vor.u32 %v2733_v53, %v2456_v51  ;;  %v1936_v47 = vld [vmem:[#allocation7 + $0x70] sm:$0xf]  ;;  %v2603_v48 = vld [vmem:[#allocation7 + $0x94] sm:$0xf0] }
 0x183   :  { %1434 = vmatpush.bf16.msra.mxu0 %v2013_v62  ;;  %1447 = vmatpush.bf16.msra.mxu1 %v2333_v63  ;;  %v2141_v62 = vor.u32 %v2648_v54, %v2138_v55  ;;  %v2461_v63 = vor.u32 %v2728_v56, %v2458_v57  ;;  %v2256_v51 = vld [vmem:[#allocation7 + $0x2f0] sm:$0xf]  ;;  %v2683_v53 = vld [vmem:[#allocation7 + $0x314] sm:$0xf0]  ;;  %v2598_v54 = vld [vmem:[#allocation7 + $0x74] sm:$0xf] }
 0x184   :  { %v1938_v55 = vld [vmem:[#allocation7 + $0x98] sm:$0xf0]  ;;  %v2678_v56 = vld [vmem:[#allocation7 + $0x2f4] sm:$0xf] }
 0x185   :  { %v2258_v57 = vld [vmem:[#allocation7 + $0x318] sm:$0xf0] }
 0x186   :  { %1409 = vmatpush.bf16.msrb.mxu2 %v1969_v6  ;;  %1422 = vmatpush.bf16.msrb.mxu3 %v2289_v52  ;;  %v2097_v6 = vor.u32 %v2643_v61, %v2096_v60  ;;  %v2417_v52 = vor.u32 %v2723_v1, %v2416_v0  ;;  %v1896_v60 = vld [vmem:[#allocation7 + $0x20] sm:$0xf]  ;;  %v2593_v61 = vld [vmem:[#allocation7 + $0x44] sm:$0xf0] }
 0x187   :  { %1435 = vmatpush.bf16.msra.mxu0 %v1973_v9  ;;  %1448 = vmatpush.bf16.msra.mxu1 %v2293_v10  ;;  %v2101_v9 = vor.u32 %v2638_v2, %v2098_v3  ;;  %v2421_v10 = vor.u32 %v2718_v4, %v2418_v5  ;;  %v2216_v0 = vld [vmem:[#allocation7 + $0x2a0] sm:$0xf]  ;;  %v2673_v1 = vld [vmem:[#allocation7 + $0x2c4] sm:$0xf0]  ;;  %v2588_v2 = vld [vmem:[#allocation7 + $0x24] sm:$0xf] }
 0x188   :  { %v1898_v3 = vld [vmem:[#allocation7 + $0x48] sm:$0xf0]  ;;  %v2668_v4 = vld [vmem:[#allocation7 + $0x2a4] sm:$0xf] }
 0x189   :  { %v2218_v5 = vld [vmem:[#allocation7 + $0x2c8] sm:$0xf0]  ;;  %v1901_v7 = vor.u32 %v2588_v2, %v1898_v3 }
 0x18a   :  { %1410 = vmatpush.bf16.msrb.mxu2 %v1929_v18  ;;  %1423 = vmatpush.bf16.msrb.mxu3 %v2249_v19  ;;  %v2377_v18 = vor.u32 %v2713_v12, %v2376_v11  ;;  %v2016_v19 = vld [vmem:[#allocation7 + $0x110] sm:$0xf]  ;;  %v2221_v8 = vor.u32 %v2668_v4, %v2218_v5 }
 0x18b   :  { %1436 = vmatpush.bf16.msra.mxu0 %v1933_v23  ;;  %1449 = vmatpush.bf16.msra.mxu1 %v2253_v24  ;;  %v2336_v23 = vld [vmem:[#allocation7 + $0x390] sm:$0xf]  ;;  %v2703_v24 = vld [vmem:[#allocation7 + $0x3b4] sm:$0xf0]  ;;  %v2017_v42 = vor.u32 %v2623_v20, %v2016_v19 }
 0x18c   :  { %v2337_v32 = vor.u32 %v2703_v24, %v2336_v23 }
 0x18e   :  { %1411 = vmatpush.bf16.msrb.mxu2 %v1889_v36  ;;  %1424 = vmatpush.bf16.msrb.mxu3 %v2209_v37  ;;  %v2341_v36 = vor.u32 %v2698_v29, %v2338_v30  ;;  %v2296_v37 = vld [vmem:[#allocation7 + $0x340] sm:$0xf] }
 0x18f   :  { %1437 = vmatpush.bf16.msra.mxu0 %v1893_v43  ;;  %1450 = vmatpush.bf16.msra.mxu1 %v2213_v44  ;;  %v2688_v43 = vld [vmem:[#allocation7 + $0x344] sm:$0xf]  ;;  %v2298_v44 = vld [vmem:[#allocation7 + $0x368] sm:$0xf0] }
 0x191   :  { %1412 = vmatmul.bf16.vlgmr.msrb.gmra.mxu2 %v3043_v31  ;;  %1425 = vmatmul.bf16.vlgmr.msrb.gmra.mxu3 %v3047_v40 }
 0x192   :  { %1456 = vmatpush.bf16.msra.mxu2 %v2177_v45  ;;  %1469 = vmatpush.bf16.msra.mxu3 %v2497_v46  ;;  %v1977_v45 = vor.u32 %v2613_v34, %v1976_v33  ;;  %v2297_v46 = vor.u32 %v2693_v38, %v2296_v37 }
 0x193   :  { %1482 = vmatpush.bf16.msrb.mxu0 %v2181_v49  ;;  %1495 = vmatpush.bf16.msrb.mxu1 %v2501_v50  ;;  %v1981_v49 = vor.u32 %v2608_v39, %v1978_v41  ;;  %v2301_v50 = vor.u32 %v2688_v43, %v2298_v44 }
 0x194   :  { %1438 = vmatmul.bf16.vlgmr.msra.gmra.mxu0 %v3043_v31  ;;  %1451 = vmatmul.bf16.vlgmr.msra.gmra.mxu1 %v3047_v40 }
 0x196   :  { %1457 = vmatpush.bf16.msra.mxu2 %v2137_v58  ;;  %1470 = vmatpush.bf16.msra.mxu3 %v2457_v59  ;;  %v1937_v58 = vor.u32 %v2603_v48, %v1936_v47  ;;  %v2257_v59 = vor.u32 %v2683_v53, %v2256_v51 }
 0x197   :  { %1483 = vmatpush.bf16.msrb.mxu0 %v2141_v62  ;;  %1496 = vmatpush.bf16.msrb.mxu1 %v2461_v63  ;;  %v1941_v62 = vor.u32 %v2598_v54, %v1938_v55  ;;  %v2261_v63 = vor.u32 %v2678_v56, %v2258_v57 }
 0x19a   :  { %1458 = vmatpush.bf16.msra.mxu2 %v2097_v6  ;;  %1471 = vmatpush.bf16.msra.mxu3 %v2417_v52  ;;  %v1897_v6 = vor.u32 %v2593_v61, %v1896_v60  ;;  %v2217_v52 = vor.u32 %v2673_v1, %v2216_v0  ;;  %v99_v1 = vld [vmem:[#allocation10 + $0x18] sm:$0x77] }
 0x19b   :  { %1484 = vmatpush.bf16.msrb.mxu0 %v2101_v9  ;;  %1497 = vmatpush.bf16.msrb.mxu1 %v2421_v10  ;;  %v3069_v9 = vld [vmem:[#allocation10] sm:$0x77]  ;;  %v425_v2 = vperm.slane %v99_v1, 5 }
 0x19c   :  { %v419_v10 = vperm.slane %v3069_v9, 5  ;;  %v418_v12 = vperm.slane %v3069_v9, 1 }
 0x19d   :  { %v445_v5 = vperm.slane %v425_v2, 1 }
 0x19e   :  { %1459 = vmatpush.bf16.msra.mxu2 %v2057_v17  ;;  %1472 = vmatpush.bf16.msra.mxu3 %v2377_v18  ;;  %v439_v11 = vperm.slane %v419_v10, 1  ;;  %v438_v16 = vperm.slane %v418_v12, 1 }
 0x19f   :  { %1485 = vmatpush.bf16.msrb.mxu0 %v2061_v21  ;;  %1498 = vmatpush.bf16.msrb.mxu1 %v2381_v22  ;;  %v97_v21 = vld [vmem:[#allocation10 + $0x8] sm:$0x77] }
 0x1a0   :  { %v421_v23 = vperm.slane %v97_v21, 5  ;;  %v420_v29 = vperm.slane %v97_v21, 1 }
 0x1a2   :  { %1460 = vmatpush.bf16.msra.mxu2 %v2017_v42  ;;  %1473 = vmatpush.bf16.msra.mxu3 %v2337_v32  ;;  %v441_v28 = vperm.slane %v421_v23, 1  ;;  %v440_v33 = vperm.slane %v420_v29, 1  ;;  %v2758_v23 = vld [vmem:[#allocation8 + $0x70] sm:$0xff]  ;;  %v2751_v29 = vld [vmem:[#allocation8 + $0x38] sm:$0xff] }
 0x1a3   :  { %1486 = vmatpush.bf16.msrb.mxu0 %v2021_v35  ;;  %1499 = vmatpush.bf16.msrb.mxu1 %v2341_v36 }
 0x1a6   :  { %1461 = vmatpush.bf16.msra.mxu2 %v1977_v45  ;;  %1474 = vmatpush.bf16.msra.mxu3 %v2297_v46  ;;  %v98_v45 = vld [vmem:[#allocation10 + $0x10] sm:$0x77] }
 0x1a7   :  { %1487 = vmatpush.bf16.msrb.mxu0 %v1981_v49  ;;  %1500 = vmatpush.bf16.msrb.mxu1 %v2301_v50  ;;  %v423_v46 = vperm.slane %v98_v45, 5  ;;  %v422_v50 = vperm.slane %v98_v45, 1 }
 0x1a9   :  { %v443_v49 = vperm.slane %v423_v46, 1  ;;  %v442_v55 = vperm.slane %v422_v50, 1  ;;  %v100_v46 = vld [vmem:[#allocation10 + $0x20] sm:$0x77] }
 0x1aa   :  { %1462 = vmatpush.bf16.msra.mxu2 %v1937_v58  ;;  %1475 = vmatpush.bf16.msra.mxu3 %v2257_v59  ;;  %v427_v50 = vperm.slane %v100_v46, 5 }
 0x1ab   :  { %1488 = vmatpush.bf16.msrb.mxu0 %v1941_v62  ;;  %1501 = vmatpush.bf16.msrb.mxu1 %v2261_v63 }
 0x1ae   :  { %1463 = vmatpush.bf16.msra.mxu2 %v1897_v6  ;;  %1476 = vmatpush.bf16.msra.mxu3 %v2217_v52  ;;  %v424_v52 = vperm.slane %v99_v1, 1 }
 0x1af   :  { %1489 = vmatpush.bf16.msrb.mxu0 %v1901_v7  ;;  %1502 = vmatpush.bf16.msrb.mxu1 %v2221_v8 }
 0x1b0   :  { %v444_v12 = vperm.slane %v424_v52, 1  ;;  %v2747_v52 = vld [vmem:[#allocation8 + $0x18] sm:$0xff] }
 0x1b1   :  { %1464 = vmatmul.bf16.vlgmr.msra.gmra.mxu2 %v3043_v31  ;;  %1477 = vmatmul.bf16.vlgmr.msra.gmra.mxu3 %v3047_v40 }
 0x1b2   :  { %1490 = vmatmul.bf16.vlgmr.msrb.gmra.mxu0 %v3043_v31  ;;  %1503 = vmatmul.bf16.vlgmr.msrb.gmra.mxu1 %v3047_v40 }
 0x1b3   :  { %1765 = vmatpush.bf16.msrb.mxu2 %v2751_v29 }
 0x1ce   :  { %v1283_v13 = vpop.f32.mrf.mxu0  ;;  %v1296_v14 = vpop.f32.mrf.mxu1 }
 0x1cf   :  { %v1284_v15 = vadd.f32 %v1283_v13, %v439_v11 }
 0x1d1   :  { %v3073_v17 = vadd.f32 %v1296_v14, %v1284_v15 }
 0x1d3   :  { %v1257_v18 = vpop.f32.mrf.mxu2  ;;  %v1270_v19 = vpop.f32.mrf.mxu3 }
 0x1d4   :  { %v1258_v20 = vadd.f32 %v1257_v18, %v438_v16  ;;  %v2759_v18 = vld [vmem:[#allocation8 + $0x78] sm:$0xff] }
 0x1d5   :  { %1778 = vmatpush.bf16.msrb.mxu3 %v2759_v18  ;;  %v2746_v18 = vld [vmem:[#allocation8 + $0x10] sm:$0xff] }
 0x1d6   :  { %v3075_v31 = vadd.f32 %v1270_v19, %v1258_v20  ;;  %v1285_v40 = vpop.f32.mrf.mxu0  ;;  %v1298_v22 = vpop.f32.mrf.mxu1 }
 0x1d9   :  { %1779 = vmatpush.bf16.msrb.mxu3 %v2758_v23 }
 0x1db   :  { %v1259_v24 = vpop.f32.mrf.mxu2  ;;  %v1272_v25 = vpop.f32.mrf.mxu3 }
 0x1de   :  { %v1335_v30 = vpop.f32.mrf.mxu0  ;;  %v1348_v42 = vpop.f32.mrf.mxu1 }
 0x1df   :  { %v1336_v32 = vadd.f32 %v1335_v30, %v441_v28 }
 0x1e1   :  { %v3077_v34 = vadd.f32 %v1348_v42, %v1336_v32 }
 0x1e3   :  { %v1309_v35 = vpop.f32.mrf.mxu2  ;;  %v1322_v36 = vpop.f32.mrf.mxu3 }
 0x1e4   :  { %v1310_v37 = vadd.f32 %v1309_v35, %v440_v33  ;;  %v2757_v33 = vld [vmem:[#allocation8 + $0x68] sm:$0xff] }
 0x1e5   :  { %1780 = vmatpush.bf16.msrb.mxu3 %v2757_v33 }
 0x1e6   :  { %v3079_v38 = vadd.f32 %v1322_v36, %v1310_v37  ;;  %v1337_v39 = vpop.f32.mrf.mxu0  ;;  %v1350_v41 = vpop.f32.mrf.mxu1 }
 0x1e7   :  { %v2750_v39 = vld [vmem:[#allocation8 + $0x30] sm:$0xff]  ;;  %v2756_v41 = vld [vmem:[#allocation8 + $0x60] sm:$0xff] }
 0x1e8   :  { %1766 = vmatpush.bf16.msrb.mxu2 %v2750_v39 }
 0x1e9   :  { %1781 = vmatpush.bf16.msrb.mxu3 %v2756_v41 }
 0x1eb   :  { %v1311_v43 = vpop.f32.mrf.mxu2  ;;  %v1324_v44 = vpop.f32.mrf.mxu3 }
 0x1f1   :  { %v1387_v47 = vpop.f32.mrf.mxu0  ;;  %v1400_v48 = vpop.f32.mrf.mxu1 }
 0x1f2   :  { %v1388_v54 = vadd.f32 %v1387_v47, %v443_v49 }
 0x1f4   :  { %v1361_v51 = vpop.f32.mrf.mxu2  ;;  %v1374_v53 = vpop.f32.mrf.mxu3  ;;  %v1401_v58 = vadd.f32 %v1400_v48, %v1388_v54  ;;  %v2749_v48 = vld [vmem:[#allocation8 + $0x28] sm:$0xff] }
 0x1f5   :  { %v1362_v59 = vadd.f32 %v1361_v51, %v442_v55  ;;  %1767 = vmatpush.bf16.msrb.mxu2 %v2749_v48  ;;  %v2755_v51 = vld [vmem:[#allocation8 + $0x58] sm:$0xff] }
 0x1f6   :  { %v2503_v62 = vmul.f32 -1.442695, %v1401_v58  ;;  %1782 = vmatpush.bf16.msrb.mxu3 %v2755_v51  ;;  %v2748_v58 = vld [vmem:[#allocation8 + $0x20] sm:$0xff] }
 0x1f7   :  { %v1375_v63 = vadd.f32 %v1374_v53, %v1362_v59 }
 0x1f8   :  { %2777 = vpow2.f32 %v2503_v62  ;;  %v447_v62 = vperm.slane %v427_v50, 1 }
 0x1f9   :  { %v1389_v56 = vpop.f32.mrf.mxu0  ;;  %v1402_v57 = vpop.f32.mrf.mxu1  ;;  %v2502_v0 = vmul.f32 -1.442695, %v1375_v63  ;;  %v426_v63 = vperm.slane %v100_v46, 1  ;;  %1768 = vmatpush.bf16.msrb.mxu2 %v2748_v58 }
 0x1fb   :  { %2779 = vpow2.f32 %v2502_v0  ;;  %v2754_v0 = vld [vmem:[#allocation8 + $0x50] sm:$0xff] }
 0x1fc   :  { %v1363_v60 = vpop.f32.mrf.mxu2  ;;  %v1376_v61 = vpop.f32.mrf.mxu3  ;;  %1783 = vmatpush.bf16.msrb.mxu3 %v2754_v0 }
 0x1fd   :  { %1769 = vmatpush.bf16.msrb.mxu2 %v2747_v52 }
 0x1fe   :  { %v2778_v3 = vpop.eup %2777 }
 0x1ff   :  { %v3081_v4 = vadd.f32 1.0, %v2778_v3 }
 0x201   :  { %v2780_v6 = vpop.eup %2779  ;;  %2781 = vrcp.f32 %v3081_v4  ;;  %v1558_v49 = vand.u32 2147483648, %v3081_v4  ;;  %v1556_v56 = vand.u32 2147483647, %v3081_v4  ;;  %vm1552_vm7 = vweird.f32 %v3081_v4  ;;  %1770 = vmatpush.bf16.msrb.mxu2 %v2746_v18 }
 0x202   :  { %v3084_v10 = vadd.f32 1.0, %v2780_v6 }
 0x203   :  { %v1559_v60 = vor.u32 1.1754944e-38, %v1558_v49  ;;  %vm1557_vm11 = vcmp.eq.f32.partialorder %v1556_v56, 8.507059e+37 }
 0x204   :  { %2783 = vrcp.f32 %v3084_v10  ;;  %vm1537_vm12 = vweird.f32 %v3084_v10 }
 0x207   :  { %v3087_v20 = vpop.eup %2781 }
 0x208   :  { %v1548_v24 = vmul.f32 %v3087_v20, %v3081_v4  ;;  %vm1553_vm6 = vweird.f32 %v3087_v20 }
 0x209   :  { %vm3109_vm8 = vmor %vm1552_vm7, %vm1553_vm6 }
 0x20a   :  { %v3091_v28 = vpop.eup %2783  ;;  %v1549_v35 = vsub.f32 1.0, %v1548_v24 }
 0x20b   :  { %v1533_v36 = vmul.f32 %v3091_v28, %v3084_v10  ;;  %vm1538_vm9 = vweird.f32 %v3091_v28 }
 0x20c   :  { %v1550_v44 = vmul.f32 %v3087_v20, %v1549_v35  ;;  %vm3126_vm13 = vmor %vm1537_vm12, %vm1538_vm9  ;;  %v2745_v35 = vld [vmem:[#allocation8 + $0x8] sm:$0xff] }
 0x20d   :  { %v1534_v45 = vsub.f32 1.0, %v1533_v36  ;;  %1771 = vmatpush.bf16.msrb.mxu2 %v2745_v35 }
 0x20e   :  { %v1551_v55 = vadd.f32 %v3087_v20, %v1550_v44 }
 0x20f   :  { %v1535_v54 = vmul.f32 %v3091_v28, %v1534_v45 }
 0x210   :  { %v1555_v2 = vsel %vm3109_vm8, %v3087_v20, %v1551_v55 }
 0x211   :  { %v1439_v7 = vpop.f32.mrf.mxu0  ;;  %v1452_v8 = vpop.f32.mrf.mxu1  ;;  %v1536_v3 = vadd.f32 %v3091_v28, %v1535_v54 }
 0x212   :  { %v1440_v11 = vadd.f32 %v1439_v7, %v445_v5  ;;  %v1541_v7 = vand.u32 2147483647, %v3084_v10 }
 0x214   :  { %v1453_v13 = vadd.f32 %v1452_v8, %v1440_v11  ;;  %v1413_v15 = vpop.f32.mrf.mxu2  ;;  %v1426_v16 = vpop.f32.mrf.mxu3  ;;  %v1543_v8 = vand.u32 2147483648, %v3084_v10  ;;  %vm1542_vm3 = vcmp.eq.f32.partialorder %v1541_v7, 8.507059e+37 }
 0x215   :  { %v1414_v19 = vadd.f32 %v1413_v15, %v444_v12  ;;  %v446_v15 = vperm.slane %v426_v63, 1 }
 0x216   :  { %v2505_v14 = vmul.f32 -1.442695, %v1453_v13  ;;  %v1544_v33 = vor.u32 1.1754944e-38, %v1543_v8 }
 0x217   :  { %v1427_v21 = vadd.f32 %v1426_v16, %v1414_v19  ;;  %v2753_v16 = vld [vmem:[#allocation8 + $0x48] sm:$0xff]  ;;  %v1560_v19 = vsel %vm1557_vm11, %v1559_v60, %v1555_v2 }
 0x218   :  { %2785 = vpow2.f32 %v2505_v14  ;;  %1784 = vmatpush.bf16.msrb.mxu3 %v2753_v16  ;;  %v1623_v36 = vmul.f32 %v1560_v19, %v3073_v17 }
 0x219   :  { %v1441_v40 = vpop.f32.mrf.mxu0  ;;  %v1454_v22 = vpop.f32.mrf.mxu1  ;;  %v2504_v25 = vmul.f32 -1.442695, %v1427_v21 }
 0x21a   :  { %v1540_v22 = vsel %vm3126_vm13, %v3091_v28, %v1536_v3 }
 0x21b   :  { %2787 = vpow2.f32 %v2504_v25  ;;  %v2752_v25 = vld [vmem:[#allocation8 + $0x40] sm:$0xff]  ;;  %v1545_v48 = vsel %vm1542_vm3, %v1544_v33, %v1540_v22 }
 0x21c   :  { %v1415_v42 = vpop.f32.mrf.mxu2  ;;  %v1428_v32 = vpop.f32.mrf.mxu3  ;;  %1785 = vmatpush.bf16.msrb.mxu3 %v2752_v25 }
 0x21e   :  { %v2786_v30 = vpop.eup %2785 }
 0x21f   :  { %v3095_v37 = vadd.f32 1.0, %v2786_v30 }
 0x221   :  { %2789 = vrcp.f32 %v3095_v37  ;;  %v2788_v43 = vpop.eup %2787  ;;  %v1588_v1 = vand.u32 2147483648, %v3095_v37  ;;  %v1586_v6 = vand.u32 2147483647, %v3095_v37  ;;  %vm1582_vm14 = vweird.f32 %v3095_v37 }
 0x222   :  { %v3099_v47 = vadd.f32 1.0, %v2788_v43 }
 0x223   :  { %v1589_v10 = vor.u32 1.1754944e-38, %v1588_v1  ;;  %vm1587_vm0 = vcmp.eq.f32.partialorder %v1586_v6, 8.507059e+37 }
 0x224   :  { %2791 = vrcp.f32 %v3099_v47  ;;  %v1571_v23 = vand.u32 2147483647, %v3099_v47  ;;  %v1573_v24 = vand.u32 2147483648, %v3099_v47  ;;  %vm1567_vm2 = vweird.f32 %v3099_v47 }
 0x226   :  { %v1574_v44 = vor.u32 1.1754944e-38, %v1573_v24  ;;  %vm1572_vm5 = vcmp.eq.f32.partialorder %v1571_v23, 8.507059e+37 }
 0x227   :  { %v2790_v53 = vpop.eup %2789 }
 0x228   :  { %v1578_v57 = vmul.f32 %v2790_v53, %v3095_v37  ;;  %vm1583_vm10 = vweird.f32 %v2790_v53 }
 0x229   :  { %vm1584_vm15 = vmor %vm1582_vm14, %vm1583_vm10 }
 0x22a   :  { %v1579_v61 = vsub.f32 1.0, %v1578_v57  ;;  %v2792_v4 = vpop.eup %2791 }
 0x22b   :  { %v1563_v11 = vmul.f32 %v2792_v4, %v3099_v47  ;;  %vm1568_vm1 = vweird.f32 %v2792_v4  ;;  %v2744_v47 = vld [vmem:[#allocation8] sm:$0xff] }
 0x22c   :  { %v1580_v5 = vmul.f32 %v2790_v53, %v1579_v61  ;;  %vm1569_vm4 = vmor %vm1567_vm2, %vm1568_vm1  ;;  %1772 = vmatpush.bf16.msrb.mxu2 %v2744_v47 }
 0x22d   :  { %v1564_v21 = vsub.f32 1.0, %v1563_v11 }
 0x22e   :  { %v1581_v20 = vadd.f32 %v2790_v53, %v1580_v5 }
 0x22f   :  { %v1491_v13 = vpop.f32.mrf.mxu0  ;;  %v1504_v14 = vpop.f32.mrf.mxu1  ;;  %v1565_v30 = vmul.f32 %v2792_v4, %v1564_v21 }
 0x230   :  { %v1492_v40 = vadd.f32 %v1491_v13, %v447_v62  ;;  %v1585_v29 = vsel %vm1584_vm15, %v2790_v53, %v1581_v20  ;;  %v1622_v53 = vmul.f32 %v1545_v48, %v3075_v31 }
 0x231   :  { %v1590_v32 = vsel %vm1587_vm0, %v1589_v10, %v1585_v29  ;;  %v1566_v43 = vadd.f32 %v2792_v4, %v1565_v30 }
 0x232   :  { %v1505_v42 = vadd.f32 %v1504_v14, %v1492_v40  ;;  %v1625_v37 = vmul.f32 %v1590_v32, %v3077_v34 }
 0x233   :  { %v1570_v49 = vsel %vm1569_vm4, %v2792_v4, %v1566_v43 }
 0x234   :  { %v2507_v28 = vmul.f32 -1.442695, %v1505_v42  ;;  %v1465_v39 = vpop.f32.mrf.mxu2  ;;  %v1478_v41 = vpop.f32.mrf.mxu3  ;;  %v1627_v46 = vadd.f32 %v1625_v37, %v1623_v36  ;;  %v1575_v34 = vsel %vm1572_vm5, %v1574_v44, %v1570_v49 }
 0x235   :  { %v1466_v45 = vadd.f32 %v1465_v39, %v446_v15  ;;  %v1624_v54 = vmul.f32 %v1575_v34, %v3079_v38 }
 0x236   :  { %2793 = vpow2.f32 %v2507_v28 }
 0x237   :  { %v1479_v50 = vadd.f32 %v1478_v41, %v1466_v45  ;;  %v1493_v17 = vpop.f32.mrf.mxu0  ;;  %v1506_v51 = vpop.f32.mrf.mxu1  ;;  %v1626_v56 = vadd.f32 %v1624_v54, %v1622_v53 }
 0x239   :  { %v2506_v55 = vmul.f32 -1.442695, %v1479_v50 }
 0x23b   :  { %2795 = vpow2.f32 %v2506_v55 }
 0x23c   :  { %v2794_v57 = vpop.eup %2793  ;;  %v1467_v58 = vpop.f32.mrf.mxu2 }
 0x23d   :  { %v1480_v59 = vpop.f32.mrf.mxu3  ;;  %v1531_v60 = vadd.f32 1.0, %v2794_v57 }
 0x23f   :  { %2797 = vrcp.f32 %v1531_v60  ;;  %v1618_v2 = vand.u32 2147483648, %v1531_v60  ;;  %v1616_v38 = vand.u32 2147483647, %v1531_v60  ;;  %vm1612_vm7 = vweird.f32 %v1531_v60 }
 0x241   :  { %v2796_v61 = vpop.eup %2795  ;;  %v1619_v52 = vor.u32 1.1754944e-38, %v1618_v2  ;;  %vm1617_vm9 = vcmp.eq.f32.partialorder %v1616_v38, 8.507059e+37 }
 0x242   :  { %v1530_v62 = vadd.f32 1.0, %v2796_v61 }
 0x244   :  { %2799 = vrcp.f32 %v1530_v62  ;;  %v1603_v7 = vand.u32 2147483648, %v1530_v62  ;;  %v1601_v13 = vand.u32 2147483647, %v1530_v62  ;;  %vm1597_vm11 = vweird.f32 %v1530_v62 }
 0x245   :  { %v2798_v63 = vpop.eup %2797 }
 0x246   :  { %v1608_v0 = vmul.f32 %v2798_v63, %v1531_v60  ;;  %vm1613_vm6 = vweird.f32 %v2798_v63  ;;  %v1604_v18 = vor.u32 1.1754944e-38, %v1603_v7  ;;  %vm1602_vm13 = vcmp.eq.f32.partialorder %v1601_v13, 8.507059e+37 }
 0x247   :  { %vm1614_vm8 = vmor %vm1612_vm7, %vm1613_vm6 }
 0x248   :  { %v1609_v1 = vsub.f32 1.0, %v1608_v0 }
 0x24a   :  { %v2800_v3 = vpop.eup %2799  ;;  %v1610_v31 = vmul.f32 %v2798_v63, %v1609_v1 }
 0x24b   :  { %v1593_v4 = vmul.f32 %v2800_v3, %v1530_v62  ;;  %vm1598_vm10 = vweird.f32 %v2800_v3 }
 0x24c   :  { %v1611_v5 = vadd.f32 %v2798_v63, %v1610_v31  ;;  %vm1599_vm12 = vmor %vm1597_vm11, %vm1598_vm10 }
 0x24d   :  { %v1594_v6 = vsub.f32 1.0, %v1593_v4 }
 0x24e   :  { %v1615_v8 = vsel %vm1614_vm8, %v2798_v63, %v1611_v5 }
 0x24f   :  { %v1595_v11 = vmul.f32 %v2800_v3, %v1594_v6  ;;  %v1620_v12 = vsel %vm1617_vm9, %v1619_v52, %v1615_v8 }
 0x250   :  { %v1629_v14 = vmul.f32 %v1620_v12, %v3039_v27  ;;  %v1668_v27 = vperm.slane %v3069_v9, 2 }
 0x251   :  { %v1596_v15 = vadd.f32 %v2800_v3, %v1595_v11 }
 0x252   :  { %v1631_v16 = vadd.f32 %v1629_v14, %v1627_v46 }
 0x253   :  { %v1600_v19 = vsel %vm1599_vm12, %v2800_v3, %v1596_v15 }
 0x254   :  { %v1633_v20 = vmax.f32 %v1631_v16, 0.0  ;;  %v1605_v10 = vsel %vm1602_vm13, %v1604_v18, %v1600_v19 }
 0x255   :  { %v1628_v21 = vmul.f32 %v1605_v10, %v3037_v26 }
 0x256   :  { %v1635_v40 = vpack.c.bf16 %v1633_v20, %v1633_v20 }
 0x257   :  { %v1630_v22 = vadd.f32 %v1628_v21, %v1626_v56 }
 0x258   :  { %1786 = vmatmul.bf16.vlgmr.msrb.gmra.mxu3 %v1635_v40 }
 0x259   :  { %v1632_v23 = vmax.f32 %v1630_v22, 0.0 }
 0x25b   :  { %v1634_v24 = vpack.c.bf16 %v1632_v23, %v1632_v23 }
 0x25d   :  { %1773 = vmatmul.bf16.vlgmr.msrb.gmra.mxu2 %v1634_v24 }
 0x2db   :  { %v1787_v25 = vpop.f32.mrf.mxu3 }
 0x2e0   :  { %v1774_v29 = vpop.f32.mrf.mxu2 }
 0x2e1   :  { %v1775_v30 = vadd.f32 %v1774_v29, %v1668_v27 }
 0x2e3   :  { %v1788_v42 = vadd.f32 %v1787_v25, %v1775_v30  ;;  %v1789_v32 = vpop.f32.mrf.mxu3 }
 0x2e5   :  { %v1791_v26 = vpack.c.bf16 %v1788_v42, %v1788_v42 }
 0x2e7   :  { %1792 = vst [vmem:[#allocation11] sm:$0x1] %v1791_v26 }
 0x2e8   :  { %v1776_v33 = vpop.f32.mrf.mxu2  ;;  %1803 = dma.vmem_to_hbm [thread:$0]  %s1799_s4, 16, %s1801_s23, [#allocation4]  }
 0x2e9   :  { %2952 = dma.done.wait [#allocation4], 16  }
 0x2ea   :  { %2953 = vsyncadd [#allocation4], 4294967280 }
 0x2eb   :  { %1808 = vsyncpa [#allocation3], 1 }
 0x2ec   :  { %1809 = vsyncpa [#allocation6], 1 }
 0x2ed   :  { %1810 = vsyncpa [#allocation9], 1 }
 0x2ee   :  { %1811 = vsyncpa [#allocation4], 1 }

</bundles_post_ra>
